<compile_context>
chip_gen: v7x
topology: tpu7x:2x2x1
jax: 0.10.0
libtpu: 0.0.40
codegen_flags: <defaults>
</compile_context>

<pallas_src>
import math

import jax
import jax.numpy as jnp
from jax.experimental import pallas as pl
from jax.experimental.pallas import tpu as pltpu


# ----------------------------------------------------------------------------
# Small synthetic BERT config (shapes consistent with the module's forward)
# ----------------------------------------------------------------------------
VOCAB = 100
MAX_POS = 16
HIDDEN = 32          # embed_size
NUM_HEADS = 2
HEAD_DIM = HIDDEN // NUM_HEADS
INTERMEDIATE = 64
NUM_LAYERS = 2
LABELS = 5           # label_size
LABELS_PAD = 128     # lane-dense padded classifier output (sliced back to LABELS outside)
LN_EPS = 1e-12       # BERT default


# ----------------------------------------------------------------------------
# Fused encoder kernel: grid=(NUM_LAYERS,), activations resident in VMEM scratch
# ----------------------------------------------------------------------------
def _layernorm(x, g, b):
    # x: [M, H] f32, g/b: [1, H]
    mu = jnp.mean(x, axis=-1, keepdims=True)
    var = jnp.mean(jnp.square(x - mu), axis=-1, keepdims=True)
    return (x - mu) * jax.lax.rsqrt(var + LN_EPS) * g + b


def encoder_kernel(emb_ref, mask_ref, eg_ref, eb_ref,
                   wqkv_ref, bqkv_ref, wo_ref, bo_ref,
                   ln1g_ref, ln1b_ref, w1_ref, b1_ref,
                   w2_ref, b2_ref, ln2g_ref, ln2b_ref,
                   fcw_ref, fcb_ref,
                   out_ref, x_scr):
    B, S = mask_ref.shape
    H, D = HIDDEN, HEAD_DIM
    layer = pl.program_id(0)

    # --- step 0: embedding LayerNorm into the resident activation scratch ---
    @pl.when(layer == 0)
    def _():
        x_scr[...] = _layernorm(emb_ref[...].astype(jnp.float32),
                                eg_ref[...], eb_ref[...])

    x = x_scr[...]                                               # [B*S, H] f32

    # --- fused QKV projection (one [H, 3H] matmul on the MXU) ---
    qkv = jnp.dot(x, wqkv_ref[...],
                  preferred_element_type=jnp.float32) + bqkv_ref[...]   # [B*S, 3H]

    # --- in-kernel additive mask bias: [B, S] (tiny; rebuilt per layer, VPU filler) ---
    neg_bias = (1.0 - mask_ref[...].astype(jnp.float32)) * -1e9

    # --- self-attention: heads sliced from the lane dim; static loops (B, NH tiny) ---
    scale = 1.0 / math.sqrt(D)
    batch_ctx = []
    for b in range(B):
        r0 = b * S
        bias = neg_bias[b:b + 1, :]                              # [1, S] -> broadcasts over queries
        head_ctx = []
        for h in range(NUM_HEADS):
            q = qkv[r0:r0 + S, h * D:(h + 1) * D]                # [S, D]
            k = qkv[r0:r0 + S, H + h * D:H + (h + 1) * D]        # [S, D]
            v = qkv[r0:r0 + S, 2 * H + h * D:2 * H + (h + 1) * D]
            s = jax.lax.dot_general(q, k, (((1,), (1,)), ((), ())),
                                    preferred_element_type=jnp.float32)   # [S, S]
            s = s * scale + bias
            s = s - jnp.max(s, axis=-1, keepdims=True)
            p = jnp.exp(s)
            p = p * pl.reciprocal(jnp.sum(p, axis=-1, keepdims=True), approx=True)
            head_ctx.append(jnp.dot(p, v, preferred_element_type=jnp.float32))
        batch_ctx.append(jnp.concatenate(head_ctx, axis=-1))     # [S, H]
    ctx = jnp.concatenate(batch_ctx, axis=0)                     # [B*S, H]

    # --- output projection + residual + LN1 (fused epilogue) ---
    attn_out = jnp.dot(ctx, wo_ref[...],
                       preferred_element_type=jnp.float32) + bo_ref[...]
    x = _layernorm(x + attn_out, ln1g_ref[...], ln1b_ref[...])

    # --- feed-forward + residual + LN2 (fused epilogue) ---
    hidden = jnp.dot(x, w1_ref[...],
                     preferred_element_type=jnp.float32) + b1_ref[...]
    # TODO(synk): BERT uses erf-GELU; tanh approximation kept (EUP-friendly lowering),
    # reference below uses the same approximation so the check is apples-to-apples.
    hidden = jax.nn.gelu(hidden, approximate=True)
    ffn_out = jnp.dot(hidden, w2_ref[...],
                      preferred_element_type=jnp.float32) + b2_ref[...]
    x = _layernorm(x + ffn_out, ln2g_ref[...], ln2b_ref[...])

    x_scr[...] = x                                               # carry to next layer

    # --- final grid step: fused token-classification head (lane-dense padded output) ---
    @pl.when(layer == pl.num_programs(0) - 1)
    def _():
        out_ref[...] = (jnp.dot(x, fcw_ref[...], preferred_element_type=jnp.float32)
                        + fcb_ref[...]).astype(out_ref.dtype)


# ----------------------------------------------------------------------------
# Parameter init (deterministic, synthetic, layer-stacked for index_map selection)
# ----------------------------------------------------------------------------
def init_params(key):
    keys = iter(jax.random.split(key, 64))
    nrm = lambda shape: 0.02 * jax.random.normal(next(keys), shape, jnp.float32)

    fc_w = nrm((HIDDEN, LABELS))
    fc_w_pad = jnp.zeros((HIDDEN, LABELS_PAD), jnp.float32).at[:, :LABELS].set(fc_w)

    params = {
        "word_emb": nrm((VOCAB, HIDDEN)),
        "pos_emb": nrm((MAX_POS, HIDDEN)),
        "type_emb": nrm((2, HIDDEN)),
        "emb_ln_g": jnp.ones((1, HIDDEN), jnp.float32),
        "emb_ln_b": jnp.zeros((1, HIDDEN), jnp.float32),
        # layer-stacked weights: leading axis = layer index
        "wqkv": nrm((NUM_LAYERS, HIDDEN, 3 * HIDDEN)),
        "bqkv": jnp.zeros((NUM_LAYERS, 1, 3 * HIDDEN), jnp.float32),
        "wo": nrm((NUM_LAYERS, HIDDEN, HIDDEN)),
        "bo": jnp.zeros((NUM_LAYERS, 1, HIDDEN), jnp.float32),
        "ln1_g": jnp.ones((NUM_LAYERS, 1, HIDDEN), jnp.float32),
        "ln1_b": jnp.zeros((NUM_LAYERS, 1, HIDDEN), jnp.float32),
        "w1": nrm((NUM_LAYERS, HIDDEN, INTERMEDIATE)),
        "b1": jnp.zeros((NUM_LAYERS, 1, INTERMEDIATE), jnp.float32),
        "w2": nrm((NUM_LAYERS, INTERMEDIATE, HIDDEN)),
        "b2": jnp.zeros((NUM_LAYERS, 1, HIDDEN), jnp.float32),
        "ln2_g": jnp.ones((NUM_LAYERS, 1, HIDDEN), jnp.float32),
        "ln2_b": jnp.zeros((NUM_LAYERS, 1, HIDDEN), jnp.float32),
        # classifier head, padded to 128 output lanes (padded columns are exact zeros)
        "fc_w": fc_w_pad,
        "fc_b": jnp.zeros((1, LABELS_PAD), jnp.float32),
    }
    return params


# ----------------------------------------------------------------------------
# Forward pass: embedding gather is JAX glue, everything else is one pallas_call
# ----------------------------------------------------------------------------
def _whole(shape):
    nd = len(shape)
    return pl.BlockSpec(shape, lambda l: (0,) * nd)


def _per_layer(shape_tail):
    # Array shape [NUM_LAYERS, *shape_tail]; grid step l selects layer l's slab
    # (leading layer dim squeezed out of the kernel Ref via `None`).
    nz = len(shape_tail)
    return pl.BlockSpec((None,) + tuple(shape_tail), lambda l: (l,) + (0,) * nz)


def bert_token_classification(params, input_ids, attention_mask, token_type_ids):
    B, S = input_ids.shape
    M = B * S

    # Embeddings (data-dependent gather stays as XLA glue).
    pos_ids = jnp.arange(S, dtype=jnp.int32)
    emb = (params["word_emb"][input_ids]
           + params["pos_emb"][pos_ids][None, :, :]
           + params["type_emb"][token_type_ids])                     # [B, S, H]
    emb2d = emb.reshape(M, HIDDEN)
    mask = attention_mask.astype(jnp.float32)                        # [B, S]

    fused = pl.pallas_call(
        encoder_kernel,
        out_shape=jax.ShapeDtypeStruct((M, LABELS_PAD), jnp.float32),
        grid_spec=pltpu.PrefetchScalarGridSpec(
            num_scalar_prefetch=0,
            grid=(NUM_LAYERS,),
            in_specs=[
                _whole((M, HIDDEN)),                   # emb
                _whole((B, S)),                        # attention mask
                _whole((1, HIDDEN)),                   # emb_ln_g
                _whole((1, HIDDEN)),                   # emb_ln_b
                _per_layer((HIDDEN, 3 * HIDDEN)),      # wqkv
                _per_layer((1, 3 * HIDDEN)),           # bqkv
                _per_layer((HIDDEN, HIDDEN)),          # wo
                _per_layer((1, HIDDEN)),               # bo
                _per_layer((1, HIDDEN)),               # ln1_g
                _per_layer((1, HIDDEN)),               # ln1_b
                _per_layer((HIDDEN, INTERMEDIATE)),    # w1
                _per_layer((1, INTERMEDIATE)),         # b1
                _per_layer((INTERMEDIATE, HIDDEN)),    # w2
                _per_layer((1, HIDDEN)),               # b2
                _per_layer((1, HIDDEN)),               # ln2_g
                _per_layer((1, HIDDEN)),               # ln2_b
                _whole((HIDDEN, LABELS_PAD)),          # fc_w (padded)
                _whole((1, LABELS_PAD)),               # fc_b (padded)
            ],
            out_specs=pl.BlockSpec((M, LABELS_PAD), lambda l: (0, 0)),
            scratch_shapes=[pltpu.VMEM((M, HIDDEN), jnp.float32)],
        ),
        compiler_params=pltpu.CompilerParams(
            dimension_semantics=("arbitrary",)),       # layer axis carries state in scratch
    )

    logits_pad = fused(
        emb2d, mask, params["emb_ln_g"], params["emb_ln_b"],
        params["wqkv"], params["bqkv"], params["wo"], params["bo"],
        params["ln1_g"], params["ln1_b"], params["w1"], params["b1"],
        params["w2"], params["b2"], params["ln2_g"], params["ln2_b"],
        params["fc_w"], params["fc_b"])

    return logits_pad[:, :LABELS].reshape(B, S, LABELS)


# ----------------------------------------------------------------------------
# Pure-JAX reference (same approximations) for a correctness check
# ----------------------------------------------------------------------------
def bert_reference(params, input_ids, attention_mask, token_type_ids):
    B, S = input_ids.shape
    pos_ids = jnp.arange(S, dtype=jnp.int32)
    x = (params["word_emb"][input_ids]
         + params["pos_emb"][pos_ids][None, :, :]
         + params["type_emb"][token_type_ids])

    def ln(x, g, b):
        mu = x.mean(-1, keepdims=True)
        var = ((x - mu) ** 2).mean(-1, keepdims=True)
        return (x - mu) * jax.lax.rsqrt(var + LN_EPS) * g + b

    x = ln(x, params["emb_ln_g"][0], params["emb_ln_b"][0])
    bias = (1.0 - attention_mask.astype(jnp.float32)) * -1e9          # [B, S]

    for l in range(NUM_LAYERS):
        qkv = x @ params["wqkv"][l] + params["bqkv"][l]
        q, k, v = jnp.split(qkv, 3, axis=-1)
        heads = lambda t: t.reshape(B, S, NUM_HEADS, HEAD_DIM).transpose(0, 2, 1, 3)
        qh, kh, vh = heads(q), heads(k), heads(v)
        s = jnp.einsum('bhqd,bhkd->bhqk', qh, kh) / math.sqrt(HEAD_DIM)
        s = s + bias[:, None, None, :]
        p = jax.nn.softmax(s, axis=-1)
        ctx = jnp.einsum('bhqk,bhkd->bhqd', p, vh).transpose(0, 2, 1, 3).reshape(B, S, HIDDEN)
        attn = ctx @ params["wo"][l] + params["bo"][l]
        x = ln(x + attn, params["ln1_g"][l][0], params["ln1_b"][l][0])
        h = jax.nn.gelu(x @ params["w1"][l] + params["b1"][l], approximate=True)
        ffn = h @ params["w2"][l] + params["b2"][l]
        x = ln(x + ffn, params["ln2_g"][l][0], params["ln2_b"][l][0])

    return x @ params["fc_w"][:, :LABELS] + params["fc_b"][0, :LABELS]


if __name__ == "__main__":
    key = jax.random.PRNGKey(0)
    k_ids, k_params = jax.random.split(key)

    B, S = 2, 8
    input_ids = jax.random.randint(k_ids, (B, S), 0, VOCAB, dtype=jnp.int32)
    attention_mask = jnp.ones((B, S), jnp.float32)
    token_type_ids = jnp.zeros((B, S), jnp.int32)

    params = init_params(k_params)

    logits = bert_token_classification(params, input_ids, attention_mask, token_type_ids)
    logits = jax.block_until_ready(logits)

    assert logits.shape == (B, S, LABELS), logits.shape
    assert jnp.all(jnp.isfinite(logits))

    ref = bert_reference(params, input_ids, attention_mask, token_type_ids)
    err = float(jnp.max(jnp.abs(logits - ref)))
    assert err < 1e-3, f"max abs err vs reference: {err}"

    print("KERNEL_OK")
</pallas_src>

<mosaic_0001>
module attributes {stable_mosaic.version = 11 : i64} {
  func.func @encoder_kernel(%arg0: i32, %arg1: memref<16x32xf32, #tpu.memory_space<vmem>>, %arg2: memref<2x8xf32, #tpu.memory_space<vmem>>, %arg3: memref<1x32xf32, #tpu.memory_space<vmem>>, %arg4: memref<1x32xf32, #tpu.memory_space<vmem>>, %arg5: memref<1x32x96xf32, #tpu.memory_space<vmem>>, %arg6: memref<1x1x96xf32, #tpu.memory_space<vmem>>, %arg7: memref<1x32x32xf32, #tpu.memory_space<vmem>>, %arg8: memref<1x1x32xf32, #tpu.memory_space<vmem>>, %arg9: memref<1x1x32xf32, #tpu.memory_space<vmem>>, %arg10: memref<1x1x32xf32, #tpu.memory_space<vmem>>, %arg11: memref<1x32x64xf32, #tpu.memory_space<vmem>>, %arg12: memref<1x1x64xf32, #tpu.memory_space<vmem>>, %arg13: memref<1x64x32xf32, #tpu.memory_space<vmem>>, %arg14: memref<1x1x32xf32, #tpu.memory_space<vmem>>, %arg15: memref<1x1x32xf32, #tpu.memory_space<vmem>>, %arg16: memref<1x1x32xf32, #tpu.memory_space<vmem>>, %arg17: memref<32x128xf32, #tpu.memory_space<vmem>>, %arg18: memref<1x128xf32, #tpu.memory_space<vmem>>, %arg19: memref<16x128xf32, #tpu.memory_space<vmem>>, %arg20: memref<16x32xf32, #tpu.memory_space<vmem>>) attributes {dimension_semantics = [#tpu.dimension_semantics<arbitrary>], iteration_bounds = array<i64: 2>, scalar_prefetch = 0 : i64, scratch_operands = 1 : i64, tpu.core_type = #tpu.core_type<tc>, window_params = [{pipeline_mode = #tpu.pipeline_mode<synchronous>, transform_indices = @transform_0, window_bounds = array<i64: 16, 32>}, {pipeline_mode = #tpu.pipeline_mode<synchronous>, transform_indices = @transform_1, window_bounds = array<i64: 2, 8>}, {pipeline_mode = #tpu.pipeline_mode<synchronous>, transform_indices = @transform_2, window_bounds = array<i64: 1, 32>}, {pipeline_mode = #tpu.pipeline_mode<synchronous>, transform_indices = @transform_3, window_bounds = array<i64: 1, 32>}, {transform_indices = @transform_4, window_bounds = array<i64: 1, 32, 96>}, {transform_indices = @transform_5, window_bounds = array<i64: 1, 1, 96>}, {transform_indices = @transform_6, window_bounds = array<i64: 1, 32, 32>}, {transform_indices = @transform_7, window_bounds = array<i64: 1, 1, 32>}, {transform_indices = @transform_8, window_bounds = array<i64: 1, 1, 32>}, {transform_indices = @transform_9, window_bounds = array<i64: 1, 1, 32>}, {transform_indices = @transform_10, window_bounds = array<i64: 1, 32, 64>}, {transform_indices = @transform_11, window_bounds = array<i64: 1, 1, 64>}, {transform_indices = @transform_12, window_bounds = array<i64: 1, 64, 32>}, {transform_indices = @transform_13, window_bounds = array<i64: 1, 1, 32>}, {transform_indices = @transform_14, window_bounds = array<i64: 1, 1, 32>}, {transform_indices = @transform_15, window_bounds = array<i64: 1, 1, 32>}, {pipeline_mode = #tpu.pipeline_mode<synchronous>, transform_indices = @transform_16, window_bounds = array<i64: 32, 128>}, {pipeline_mode = #tpu.pipeline_mode<synchronous>, transform_indices = @transform_17, window_bounds = array<i64: 1, 128>}, {pipeline_mode = #tpu.pipeline_mode<synchronous>, transform_indices = @transform_18, window_bounds = array<i64: 16, 128>}]} {
    %c0_i32 = arith.constant 0 : i32
    %0 = arith.cmpi eq, %arg0, %c0_i32 : i32
    %1 = arith.extui %0 : i1 to i32
    %c0_i32_0 = arith.constant 0 : i32
    %2 = arith.cmpi ne, %1, %c0_i32_0 : i32
    scf.if %2 {
      %c0_82 = arith.constant 0 : index
      %c0_83 = arith.constant 0 : index
      %189 = vector.load %arg1[%c0_82, %c0_83] : memref<16x32xf32, #tpu.memory_space<vmem>>, vector<16x32xf32>
      %c0_84 = arith.constant 0 : index
      %c0_85 = arith.constant 0 : index
      %190 = vector.load %arg3[%c0_84, %c0_85] : memref<1x32xf32, #tpu.memory_space<vmem>>, vector<1x32xf32>
      %c0_86 = arith.constant 0 : index
      %c0_87 = arith.constant 0 : index
      %191 = vector.load %arg4[%c0_86, %c0_87] : memref<1x32xf32, #tpu.memory_space<vmem>>, vector<1x32xf32>
      %cst_88 = arith.constant dense<0.000000e+00> : vector<16xf32>
      %192 = vector.multi_reduction <add>, %189, %cst_88 [1] : vector<16x32xf32> to vector<16xf32>
      %193 = vector.shape_cast %192 : vector<16xf32> to vector<16x1xf32>
      %cst_89 = arith.constant 3.200000e+01 : f32
      %194 = vector.broadcast %cst_89 : f32 to vector<16x1xf32>
      %195 = arith.divf %193, %194 : vector<16x1xf32>
      %196 = vector.broadcast %195 : vector<16x1xf32> to vector<16x32xf32>
      %197 = arith.subf %189, %196 : vector<16x32xf32>
      %198 = arith.mulf %197, %197 : vector<16x32xf32>
      %cst_90 = arith.constant dense<0.000000e+00> : vector<16xf32>
      %199 = vector.multi_reduction <add>, %198, %cst_90 [1] : vector<16x32xf32> to vector<16xf32>
      %200 = vector.shape_cast %199 : vector<16xf32> to vector<16x1xf32>
      %cst_91 = arith.constant 3.200000e+01 : f32
      %201 = vector.broadcast %cst_91 : f32 to vector<16x1xf32>
      %202 = arith.divf %200, %201 : vector<16x1xf32>
      %203 = vector.broadcast %195 : vector<16x1xf32> to vector<16x32xf32>
      %204 = arith.subf %189, %203 : vector<16x32xf32>
      %cst_92 = arith.constant 9.99999996E-13 : f32
      %205 = vector.broadcast %cst_92 : f32 to vector<16x1xf32>
      %206 = arith.addf %202, %205 : vector<16x1xf32>
      %207 = math.rsqrt %206 : vector<16x1xf32>
      %208 = vector.broadcast %207 : vector<16x1xf32> to vector<16x32xf32>
      %209 = arith.mulf %204, %208 : vector<16x32xf32>
      %210 = vector.broadcast %190 : vector<1x32xf32> to vector<16x32xf32>
      %211 = arith.mulf %209, %210 : vector<16x32xf32>
      %212 = vector.broadcast %191 : vector<1x32xf32> to vector<16x32xf32>
      %213 = arith.addf %211, %212 : vector<16x32xf32>
      %c0_93 = arith.constant 0 : index
      %c0_94 = arith.constant 0 : index
      %214 = vector.load %arg20[%c0_93, %c0_94] : memref<16x32xf32, #tpu.memory_space<vmem>>, vector<16x32xf32>
      tpu.vector_store %arg20[%c0_93, %c0_94], %213 {strides = array<i32>} : memref<16x32xf32, #tpu.memory_space<vmem>>, vector<16x32xf32>,
    } else {
    }
    %c0 = arith.constant 0 : index
    %c0_1 = arith.constant 0 : index
    %3 = vector.load %arg20[%c0, %c0_1] : memref<16x32xf32, #tpu.memory_space<vmem>>, vector<16x32xf32>
    %c0_2 = arith.constant 0 : index
    %c0_3 = arith.constant 0 : index
    %c0_4 = arith.constant 0 : index
    %4 = vector.load %arg5[%c0_2, %c0_3, %c0_4] : memref<1x32x96xf32, #tpu.memory_space<vmem>>, vector<1x32x96xf32>
    %5 = vector.shape_cast %4 : vector<1x32x96xf32> to vector<32x96xf32>
    %cst = arith.constant dense<0.000000e+00> : vector<16x96xf32>
    %6 = tpu.matmul %3, %5, %cst {dimension_numbers = #tpu.dot_dimension_numbers<[1], [0], [0], [1], [0, 0, 1, 1], [], []>} : vector<16x32xf32>, vector<32x96xf32>, vector<16x96xf32> -> vector<16x96xf32>
    %c0_5 = arith.constant 0 : index
    %c0_6 = arith.constant 0 : index
    %c0_7 = arith.constant 0 : index
    %7 = vector.load %arg6[%c0_5, %c0_6, %c0_7] : memref<1x1x96xf32, #tpu.memory_space<vmem>>, vector<1x1x96xf32>
    %8 = vector.shape_cast %7 : vector<1x1x96xf32> to vector<1x96xf32>
    %9 = vector.broadcast %8 : vector<1x96xf32> to vector<16x96xf32>
    %10 = arith.addf %6, %9 : vector<16x96xf32>
    %c0_8 = arith.constant 0 : index
    %c0_9 = arith.constant 0 : index
    %11 = vector.load %arg2[%c0_8, %c0_9] : memref<2x8xf32, #tpu.memory_space<vmem>>, vector<2x8xf32>
    %cst_10 = arith.constant 1.000000e+00 : f32
    %12 = vector.broadcast %cst_10 : f32 to vector<2x8xf32>
    %13 = arith.subf %12, %11 : vector<2x8xf32>
    %cst_11 = arith.constant -1.000000e+09 : f32
    %14 = vector.broadcast %cst_11 : f32 to vector<2x8xf32>
    %15 = arith.mulf %13, %14 : vector<2x8xf32>
    %16 = vector.extract_strided_slice %15 {offsets = [0, 0], sizes = [1, 8], strides = [1, 1]} : vector<2x8xf32> to vector<1x8xf32>
    %17 = vector.extract_strided_slice %10 {offsets = [0, 0], sizes = [8, 16], strides = [1, 1]} : vector<16x96xf32> to vector<8x16xf32>
    %18 = vector.extract_strided_slice %10 {offsets = [0, 32], sizes = [8, 16], strides = [1, 1]} : vector<16x96xf32> to vector<8x16xf32>
    %19 = vector.extract_strided_slice %10 {offsets = [0, 64], sizes = [8, 16], strides = [1, 1]} : vector<16x96xf32> to vector<8x16xf32>
    %cst_12 = arith.constant dense<0.000000e+00> : vector<8x8xf32>
    %20 = tpu.matmul %17, %18, %cst_12 {dimension_numbers = #tpu.dot_dimension_numbers<[1], [1], [0], [0], [0, 0, 1, 0], [], []>} : vector<8x16xf32>, vector<8x16xf32>, vector<8x8xf32> -> vector<8x8xf32>
    %cst_13 = arith.constant 2.500000e-01 : f32
    %21 = vector.broadcast %cst_13 : f32 to vector<8x8xf32>
    %22 = arith.mulf %20, %21 : vector<8x8xf32>
    %23 = vector.broadcast %16 : vector<1x8xf32> to vector<8x8xf32>
    %24 = arith.addf %22, %23 : vector<8x8xf32>
    %cst_14 = arith.constant dense<0xFF800000> : vector<8xf32>
    %25 = vector.multi_reduction <maximumf>, %24, %cst_14 [1] : vector<8x8xf32> to vector<8xf32>
    %26 = vector.shape_cast %25 : vector<8xf32> to vector<8x1xf32>
    %27 = vector.broadcast %26 : vector<8x1xf32> to vector<8x8xf32>
    %28 = arith.subf %24, %27 : vector<8x8xf32>
    %29 = math.exp %28 : vector<8x8xf32>
    %cst_15 = arith.constant dense<0.000000e+00> : vector<8xf32>
    %30 = vector.multi_reduction <add>, %29, %cst_15 [1] : vector<8x8xf32> to vector<8xf32>
    %31 = vector.shape_cast %30 : vector<8xf32> to vector<8x1xf32>
    %32 = tpu.reciprocal %31 {approx = true} : vector<8x1xf32> -> vector<8x1xf32>
    %33 = vector.broadcast %32 : vector<8x1xf32> to vector<8x8xf32>
    %34 = arith.mulf %29, %33 : vector<8x8xf32>
    %cst_16 = arith.constant dense<0.000000e+00> : vector<8x16xf32>
    %35 = tpu.matmul %34, %19, %cst_16 {dimension_numbers = #tpu.dot_dimension_numbers<[1], [0], [0], [1], [0, 0, 1, 1], [], []>} : vector<8x8xf32>, vector<8x16xf32>, vector<8x16xf32> -> vector<8x16xf32>
    %36 = vector.extract_strided_slice %10 {offsets = [0, 16], sizes = [8, 16], strides = [1, 1]} : vector<16x96xf32> to vector<8x16xf32>
    %37 = vector.extract_strided_slice %10 {offsets = [0, 48], sizes = [8, 16], strides = [1, 1]} : vector<16x96xf32> to vector<8x16xf32>
    %38 = vector.extract_strided_slice %10 {offsets = [0, 80], sizes = [8, 16], strides = [1, 1]} : vector<16x96xf32> to vector<8x16xf32>
    %cst_17 = arith.constant dense<0.000000e+00> : vector<8x8xf32>
    %39 = tpu.matmul %36, %37, %cst_17 {dimension_numbers = #tpu.dot_dimension_numbers<[1], [1], [0], [0], [0, 0, 1, 0], [], []>} : vector<8x16xf32>, vector<8x16xf32>, vector<8x8xf32> -> vector<8x8xf32>
    %cst_18 = arith.constant 2.500000e-01 : f32
    %40 = vector.broadcast %cst_18 : f32 to vector<8x8xf32>
    %41 = arith.mulf %39, %40 : vector<8x8xf32>
    %42 = vector.broadcast %16 : vector<1x8xf32> to vector<8x8xf32>
    %43 = arith.addf %41, %42 : vector<8x8xf32>
    %cst_19 = arith.constant dense<0xFF800000> : vector<8xf32>
    %44 = vector.multi_reduction <maximumf>, %43, %cst_19 [1] : vector<8x8xf32> to vector<8xf32>
    %45 = vector.shape_cast %44 : vector<8xf32> to vector<8x1xf32>
    %46 = vector.broadcast %45 : vector<8x1xf32> to vector<8x8xf32>
    %47 = arith.subf %43, %46 : vector<8x8xf32>
    %48 = math.exp %47 : vector<8x8xf32>
    %cst_20 = arith.constant dense<0.000000e+00> : vector<8xf32>
    %49 = vector.multi_reduction <add>, %48, %cst_20 [1] : vector<8x8xf32> to vector<8xf32>
    %50 = vector.shape_cast %49 : vector<8xf32> to vector<8x1xf32>
    %51 = tpu.reciprocal %50 {approx = true} : vector<8x1xf32> -> vector<8x1xf32>
    %52 = vector.broadcast %51 : vector<8x1xf32> to vector<8x8xf32>
    %53 = arith.mulf %48, %52 : vector<8x8xf32>
    %cst_21 = arith.constant dense<0.000000e+00> : vector<8x16xf32>
    %54 = tpu.matmul %53, %38, %cst_21 {dimension_numbers = #tpu.dot_dimension_numbers<[1], [0], [0], [1], [0, 0, 1, 1], [], []>} : vector<8x8xf32>, vector<8x16xf32>, vector<8x16xf32> -> vector<8x16xf32>
    %55 = tpu.concatenate %35, %54 in 1 : vector<8x16xf32>, vector<8x16xf32> -> vector<8x32xf32>
    %56 = vector.extract_strided_slice %15 {offsets = [1, 0], sizes = [1, 8], strides = [1, 1]} : vector<2x8xf32> to vector<1x8xf32>
    %57 = vector.extract_strided_slice %10 {offsets = [8, 0], sizes = [8, 16], strides = [1, 1]} : vector<16x96xf32> to vector<8x16xf32>
    %58 = vector.extract_strided_slice %10 {offsets = [8, 32], sizes = [8, 16], strides = [1, 1]} : vector<16x96xf32> to vector<8x16xf32>
    %59 = vector.extract_strided_slice %10 {offsets = [8, 64], sizes = [8, 16], strides = [1, 1]} : vector<16x96xf32> to vector<8x16xf32>
    %cst_22 = arith.constant dense<0.000000e+00> : vector<8x8xf32>
    %60 = tpu.matmul %57, %58, %cst_22 {dimension_numbers = #tpu.dot_dimension_numbers<[1], [1], [0], [0], [0, 0, 1, 0], [], []>} : vector<8x16xf32>, vector<8x16xf32>, vector<8x8xf32> -> vector<8x8xf32>
    %cst_23 = arith.constant 2.500000e-01 : f32
    %61 = vector.broadcast %cst_23 : f32 to vector<8x8xf32>
    %62 = arith.mulf %60, %61 : vector<8x8xf32>
    %63 = vector.broadcast %56 : vector<1x8xf32> to vector<8x8xf32>
    %64 = arith.addf %62, %63 : vector<8x8xf32>
    %cst_24 = arith.constant dense<0xFF800000> : vector<8xf32>
    %65 = vector.multi_reduction <maximumf>, %64, %cst_24 [1] : vector<8x8xf32> to vector<8xf32>
    %66 = vector.shape_cast %65 : vector<8xf32> to vector<8x1xf32>
    %67 = vector.broadcast %66 : vector<8x1xf32> to vector<8x8xf32>
    %68 = arith.subf %64, %67 : vector<8x8xf32>
    %69 = math.exp %68 : vector<8x8xf32>
    %cst_25 = arith.constant dense<0.000000e+00> : vector<8xf32>
    %70 = vector.multi_reduction <add>, %69, %cst_25 [1] : vector<8x8xf32> to vector<8xf32>
    %71 = vector.shape_cast %70 : vector<8xf32> to vector<8x1xf32>
    %72 = tpu.reciprocal %71 {approx = true} : vector<8x1xf32> -> vector<8x1xf32>
    %73 = vector.broadcast %72 : vector<8x1xf32> to vector<8x8xf32>
    %74 = arith.mulf %69, %73 : vector<8x8xf32>
    %cst_26 = arith.constant dense<0.000000e+00> : vector<8x16xf32>
    %75 = tpu.matmul %74, %59, %cst_26 {dimension_numbers = #tpu.dot_dimension_numbers<[1], [0], [0], [1], [0, 0, 1, 1], [], []>} : vector<8x8xf32>, vector<8x16xf32>, vector<8x16xf32> -> vector<8x16xf32>
    %76 = vector.extract_strided_slice %10 {offsets = [8, 16], sizes = [8, 16], strides = [1, 1]} : vector<16x96xf32> to vector<8x16xf32>
    %77 = vector.extract_strided_slice %10 {offsets = [8, 48], sizes = [8, 16], strides = [1, 1]} : vector<16x96xf32> to vector<8x16xf32>
    %78 = vector.extract_strided_slice %10 {offsets = [8, 80], sizes = [8, 16], strides = [1, 1]} : vector<16x96xf32> to vector<8x16xf32>
    %cst_27 = arith.constant dense<0.000000e+00> : vector<8x8xf32>
    %79 = tpu.matmul %76, %77, %cst_27 {dimension_numbers = #tpu.dot_dimension_numbers<[1], [1], [0], [0], [0, 0, 1, 0], [], []>} : vector<8x16xf32>, vector<8x16xf32>, vector<8x8xf32> -> vector<8x8xf32>
    %cst_28 = arith.constant 2.500000e-01 : f32
    %80 = vector.broadcast %cst_28 : f32 to vector<8x8xf32>
    %81 = arith.mulf %79, %80 : vector<8x8xf32>
    %82 = vector.broadcast %56 : vector<1x8xf32> to vector<8x8xf32>
    %83 = arith.addf %81, %82 : vector<8x8xf32>
    %cst_29 = arith.constant dense<0xFF800000> : vector<8xf32>
    %84 = vector.multi_reduction <maximumf>, %83, %cst_29 [1] : vector<8x8xf32> to vector<8xf32>
    %85 = vector.shape_cast %84 : vector<8xf32> to vector<8x1xf32>
    %86 = vector.broadcast %85 : vector<8x1xf32> to vector<8x8xf32>
    %87 = arith.subf %83, %86 : vector<8x8xf32>
    %88 = math.exp %87 : vector<8x8xf32>
    %cst_30 = arith.constant dense<0.000000e+00> : vector<8xf32>
    %89 = vector.multi_reduction <add>, %88, %cst_30 [1] : vector<8x8xf32> to vector<8xf32>
    %90 = vector.shape_cast %89 : vector<8xf32> to vector<8x1xf32>
    %91 = tpu.reciprocal %90 {approx = true} : vector<8x1xf32> -> vector<8x1xf32>
    %92 = vector.broadcast %91 : vector<8x1xf32> to vector<8x8xf32>
    %93 = arith.mulf %88, %92 : vector<8x8xf32>
    %cst_31 = arith.constant dense<0.000000e+00> : vector<8x16xf32>
    %94 = tpu.matmul %93, %78, %cst_31 {dimension_numbers = #tpu.dot_dimension_numbers<[1], [0], [0], [1], [0, 0, 1, 1], [], []>} : vector<8x8xf32>, vector<8x16xf32>, vector<8x16xf32> -> vector<8x16xf32>
    %95 = tpu.concatenate %75, %94 in 1 : vector<8x16xf32>, vector<8x16xf32> -> vector<8x32xf32>
    %96 = tpu.concatenate %55, %95 in 0 : vector<8x32xf32>, vector<8x32xf32> -> vector<16x32xf32>
    %c0_32 = arith.constant 0 : index
    %c0_33 = arith.constant 0 : index
    %c0_34 = arith.constant 0 : index
    %97 = vector.load %arg7[%c0_32, %c0_33, %c0_34] : memref<1x32x32xf32, #tpu.memory_space<vmem>>, vector<1x32x32xf32>
    %98 = vector.shape_cast %97 : vector<1x32x32xf32> to vector<32x32xf32>
    %cst_35 = arith.constant dense<0.000000e+00> : vector<16x32xf32>
    %99 = tpu.matmul %96, %98, %cst_35 {dimension_numbers = #tpu.dot_dimension_numbers<[1], [0], [0], [1], [0, 0, 1, 1], [], []>} : vector<16x32xf32>, vector<32x32xf32>, vector<16x32xf32> -> vector<16x32xf32>
    %c0_36 = arith.constant 0 : index
    %c0_37 = arith.constant 0 : index
    %c0_38 = arith.constant 0 : index
    %100 = vector.load %arg8[%c0_36, %c0_37, %c0_38] : memref<1x1x32xf32, #tpu.memory_space<vmem>>, vector<1x1x32xf32>
    %101 = vector.shape_cast %100 : vector<1x1x32xf32> to vector<1x32xf32>
    %102 = vector.broadcast %101 : vector<1x32xf32> to vector<16x32xf32>
    %103 = arith.addf %99, %102 : vector<16x32xf32>
    %104 = arith.addf %3, %103 : vector<16x32xf32>
    %c0_39 = arith.constant 0 : index
    %c0_40 = arith.constant 0 : index
    %c0_41 = arith.constant 0 : index
    %105 = vector.load %arg9[%c0_39, %c0_40, %c0_41] : memref<1x1x32xf32, #tpu.memory_space<vmem>>, vector<1x1x32xf32>
    %106 = vector.shape_cast %105 : vector<1x1x32xf32> to vector<1x32xf32>
    %c0_42 = arith.constant 0 : index
    %c0_43 = arith.constant 0 : index
    %c0_44 = arith.constant 0 : index
    %107 = vector.load %arg10[%c0_42, %c0_43, %c0_44] : memref<1x1x32xf32, #tpu.memory_space<vmem>>, vector<1x1x32xf32>
    %108 = vector.shape_cast %107 : vector<1x1x32xf32> to vector<1x32xf32>
    %cst_45 = arith.constant dense<0.000000e+00> : vector<16xf32>
    %109 = vector.multi_reduction <add>, %104, %cst_45 [1] : vector<16x32xf32> to vector<16xf32>
    %110 = vector.shape_cast %109 : vector<16xf32> to vector<16x1xf32>
    %cst_46 = arith.constant 3.200000e+01 : f32
    %111 = vector.broadcast %cst_46 : f32 to vector<16x1xf32>
    %112 = arith.divf %110, %111 : vector<16x1xf32>
    %113 = vector.broadcast %112 : vector<16x1xf32> to vector<16x32xf32>
    %114 = arith.subf %104, %113 : vector<16x32xf32>
    %115 = arith.mulf %114, %114 : vector<16x32xf32>
    %cst_47 = arith.constant dense<0.000000e+00> : vector<16xf32>
    %116 = vector.multi_reduction <add>, %115, %cst_47 [1] : vector<16x32xf32> to vector<16xf32>
    %117 = vector.shape_cast %116 : vector<16xf32> to vector<16x1xf32>
    %cst_48 = arith.constant 3.200000e+01 : f32
    %118 = vector.broadcast %cst_48 : f32 to vector<16x1xf32>
    %119 = arith.divf %117, %118 : vector<16x1xf32>
    %120 = vector.broadcast %112 : vector<16x1xf32> to vector<16x32xf32>
    %121 = arith.subf %104, %120 : vector<16x32xf32>
    %cst_49 = arith.constant 9.99999996E-13 : f32
    %122 = vector.broadcast %cst_49 : f32 to vector<16x1xf32>
    %123 = arith.addf %119, %122 : vector<16x1xf32>
    %124 = math.rsqrt %123 : vector<16x1xf32>
    %125 = vector.broadcast %124 : vector<16x1xf32> to vector<16x32xf32>
    %126 = arith.mulf %121, %125 : vector<16x32xf32>
    %127 = vector.broadcast %106 : vector<1x32xf32> to vector<16x32xf32>
    %128 = arith.mulf %126, %127 : vector<16x32xf32>
    %129 = vector.broadcast %108 : vector<1x32xf32> to vector<16x32xf32>
    %130 = arith.addf %128, %129 : vector<16x32xf32>
    %c0_50 = arith.constant 0 : index
    %c0_51 = arith.constant 0 : index
    %c0_52 = arith.constant 0 : index
    %131 = vector.load %arg11[%c0_50, %c0_51, %c0_52] : memref<1x32x64xf32, #tpu.memory_space<vmem>>, vector<1x32x64xf32>
    %132 = vector.shape_cast %131 : vector<1x32x64xf32> to vector<32x64xf32>
    %cst_53 = arith.constant dense<0.000000e+00> : vector<16x64xf32>
    %133 = tpu.matmul %130, %132, %cst_53 {dimension_numbers = #tpu.dot_dimension_numbers<[1], [0], [0], [1], [0, 0, 1, 1], [], []>} : vector<16x32xf32>, vector<32x64xf32>, vector<16x64xf32> -> vector<16x64xf32>
    %c0_54 = arith.constant 0 : index
    %c0_55 = arith.constant 0 : index
    %c0_56 = arith.constant 0 : index
    %134 = vector.load %arg12[%c0_54, %c0_55, %c0_56] : memref<1x1x64xf32, #tpu.memory_space<vmem>>, vector<1x1x64xf32>
    %135 = vector.shape_cast %134 : vector<1x1x64xf32> to vector<1x64xf32>
    %136 = vector.broadcast %135 : vector<1x64xf32> to vector<16x64xf32>
    %137 = arith.addf %133, %136 : vector<16x64xf32>
    %138 = arith.mulf %137, %137 : vector<16x64xf32>
    %139 = arith.mulf %137, %138 : vector<16x64xf32>
    %cst_57 = arith.constant 4.471500e-02 : f32
    %140 = vector.broadcast %cst_57 : f32 to vector<16x64xf32>
    %141 = arith.mulf %140, %139 : vector<16x64xf32>
    %142 = arith.addf %137, %141 : vector<16x64xf32>
    %cst_58 = arith.constant 0.797884583 : f32
    %143 = vector.broadcast %cst_58 : f32 to vector<16x64xf32>
    %144 = arith.mulf %143, %142 : vector<16x64xf32>
    %145 = math.tanh %144 : vector<16x64xf32>
    %cst_59 = arith.constant 1.000000e+00 : f32
    %146 = vector.broadcast %cst_59 : f32 to vector<16x64xf32>
    %147 = arith.addf %146, %145 : vector<16x64xf32>
    %cst_60 = arith.constant 5.000000e-01 : f32
    %148 = vector.broadcast %cst_60 : f32 to vector<16x64xf32>
    %149 = arith.mulf %148, %147 : vector<16x64xf32>
    %150 = arith.mulf %137, %149 : vector<16x64xf32>
    %c0_61 = arith.constant 0 : index
    %c0_62 = arith.constant 0 : index
    %c0_63 = arith.constant 0 : index
    %151 = vector.load %arg13[%c0_61, %c0_62, %c0_63] : memref<1x64x32xf32, #tpu.memory_space<vmem>>, vector<1x64x32xf32>
    %152 = vector.shape_cast %151 : vector<1x64x32xf32> to vector<64x32xf32>
    %cst_64 = arith.constant dense<0.000000e+00> : vector<16x32xf32>
    %153 = tpu.matmul %150, %152, %cst_64 {dimension_numbers = #tpu.dot_dimension_numbers<[1], [0], [0], [1], [0, 0, 1, 1], [], []>} : vector<16x64xf32>, vector<64x32xf32>, vector<16x32xf32> -> vector<16x32xf32>
    %c0_65 = arith.constant 0 : index
    %c0_66 = arith.constant 0 : index
    %c0_67 = arith.constant 0 : index
    %154 = vector.load %arg14[%c0_65, %c0_66, %c0_67] : memref<1x1x32xf32, #tpu.memory_space<vmem>>, vector<1x1x32xf32>
    %155 = vector.shape_cast %154 : vector<1x1x32xf32> to vector<1x32xf32>
    %156 = vector.broadcast %155 : vector<1x32xf32> to vector<16x32xf32>
    %157 = arith.addf %153, %156 : vector<16x32xf32>
    %158 = arith.addf %130, %157 : vector<16x32xf32>
    %c0_68 = arith.constant 0 : index
    %c0_69 = arith.constant 0 : index
    %c0_70 = arith.constant 0 : index
    %159 = vector.load %arg15[%c0_68, %c0_69, %c0_70] : memref<1x1x32xf32, #tpu.memory_space<vmem>>, vector<1x1x32xf32>
    %160 = vector.shape_cast %159 : vector<1x1x32xf32> to vector<1x32xf32>
    %c0_71 = arith.constant 0 : index
    %c0_72 = arith.constant 0 : index
    %c0_73 = arith.constant 0 : index
    %161 = vector.load %arg16[%c0_71, %c0_72, %c0_73] : memref<1x1x32xf32, #tpu.memory_space<vmem>>, vector<1x1x32xf32>
    %162 = vector.shape_cast %161 : vector<1x1x32xf32> to vector<1x32xf32>
    %cst_74 = arith.constant dense<0.000000e+00> : vector<16xf32>
    %163 = vector.multi_reduction <add>, %158, %cst_74 [1] : vector<16x32xf32> to vector<16xf32>
    %164 = vector.shape_cast %163 : vector<16xf32> to vector<16x1xf32>
    %cst_75 = arith.constant 3.200000e+01 : f32
    %165 = vector.broadcast %cst_75 : f32 to vector<16x1xf32>
    %166 = arith.divf %164, %165 : vector<16x1xf32>
    %167 = vector.broadcast %166 : vector<16x1xf32> to vector<16x32xf32>
    %168 = arith.subf %158, %167 : vector<16x32xf32>
    %169 = arith.mulf %168, %168 : vector<16x32xf32>
    %cst_76 = arith.constant dense<0.000000e+00> : vector<16xf32>
    %170 = vector.multi_reduction <add>, %169, %cst_76 [1] : vector<16x32xf32> to vector<16xf32>
    %171 = vector.shape_cast %170 : vector<16xf32> to vector<16x1xf32>
    %cst_77 = arith.constant 3.200000e+01 : f32
    %172 = vector.broadcast %cst_77 : f32 to vector<16x1xf32>
    %173 = arith.divf %171, %172 : vector<16x1xf32>
    %174 = vector.broadcast %166 : vector<16x1xf32> to vector<16x32xf32>
    %175 = arith.subf %158, %174 : vector<16x32xf32>
    %cst_78 = arith.constant 9.99999996E-13 : f32
    %176 = vector.broadcast %cst_78 : f32 to vector<16x1xf32>
    %177 = arith.addf %173, %176 : vector<16x1xf32>
    %178 = math.rsqrt %177 : vector<16x1xf32>
    %179 = vector.broadcast %178 : vector<16x1xf32> to vector<16x32xf32>
    %180 = arith.mulf %175, %179 : vector<16x32xf32>
    %181 = vector.broadcast %160 : vector<1x32xf32> to vector<16x32xf32>
    %182 = arith.mulf %180, %181 : vector<16x32xf32>
    %183 = vector.broadcast %162 : vector<1x32xf32> to vector<16x32xf32>
    %184 = arith.addf %182, %183 : vector<16x32xf32>
    %c0_79 = arith.constant 0 : index
    %c0_80 = arith.constant 0 : index
    %185 = vector.load %arg20[%c0_79, %c0_80] : memref<16x32xf32, #tpu.memory_space<vmem>>, vector<16x32xf32>
    tpu.vector_store %arg20[%c0_79, %c0_80], %184 {strides = array<i32>} : memref<16x32xf32, #tpu.memory_space<vmem>>, vector<16x32xf32>,
    %c1_i32 = arith.constant 1 : i32
    %186 = arith.cmpi eq, %arg0, %c1_i32 : i32
    %187 = arith.extui %186 : i1 to i32
    %c0_i32_81 = arith.constant 0 : i32
    %188 = arith.cmpi ne, %187, %c0_i32_81 : i32
    scf.if %188 {
      %c0_82 = arith.constant 0 : index
      %c0_83 = arith.constant 0 : index
      %189 = vector.load %arg17[%c0_82, %c0_83] : memref<32x128xf32, #tpu.memory_space<vmem>>, vector<32x128xf32>
      %cst_84 = arith.constant dense<0.000000e+00> : vector<16x128xf32>
      %190 = tpu.matmul %184, %189, %cst_84 {dimension_numbers = #tpu.dot_dimension_numbers<[1], [0], [0], [1], [0, 0, 1, 1], [], []>} : vector<16x32xf32>, vector<32x128xf32>, vector<16x128xf32> -> vector<16x128xf32>
      %c0_85 = arith.constant 0 : index
      %c0_86 = arith.constant 0 : index
      %191 = vector.load %arg18[%c0_85, %c0_86] : memref<1x128xf32, #tpu.memory_space<vmem>>, vector<1x128xf32>
      %192 = vector.broadcast %191 : vector<1x128xf32> to vector<16x128xf32>
      %193 = arith.addf %190, %192 : vector<16x128xf32>
      %c0_87 = arith.constant 0 : index
      %c0_88 = arith.constant 0 : index
      %194 = vector.load %arg19[%c0_87, %c0_88] : memref<16x128xf32, #tpu.memory_space<vmem>>, vector<16x128xf32>
      tpu.vector_store %arg19[%c0_87, %c0_88], %193 {strides = array<i32>} : memref<16x128xf32, #tpu.memory_space<vmem>>, vector<16x128xf32>,
    } else {
    }
    return
  }
  func.func @transform_0(%arg0: i32) -> (i32, i32) {
    %c0_i32 = arith.constant 0 : i32
    %c0_i32_0 = arith.constant 0 : i32
    %c0_i32_1 = arith.constant 0 : i32
    return %c0_i32, %c0_i32_0 : i32, i32
  }
  func.func @transform_1(%arg0: i32) -> (i32, i32) {
    %c0_i32 = arith.constant 0 : i32
    %c0_i32_0 = arith.constant 0 : i32
    %c0_i32_1 = arith.constant 0 : i32
    return %c0_i32, %c0_i32_0 : i32, i32
  }
  func.func @transform_2(%arg0: i32) -> (i32, i32) {
    %c0_i32 = arith.constant 0 : i32
    %c0_i32_0 = arith.constant 0 : i32
    %c0_i32_1 = arith.constant 0 : i32
    return %c0_i32, %c0_i32_0 : i32, i32
  }
  func.func @transform_3(%arg0: i32) -> (i32, i32) {
    %c0_i32 = arith.constant 0 : i32
    %c0_i32_0 = arith.constant 0 : i32
    %c0_i32_1 = arith.constant 0 : i32
    return %c0_i32, %c0_i32_0 : i32, i32
  }
  func.func @transform_4(%arg0: i32) -> (i32, i32, i32) {
    %c0_i32 = arith.constant 0 : i32
    %c0_i32_0 = arith.constant 0 : i32
    %c0_i32_1 = arith.constant 0 : i32
    return %arg0, %c0_i32, %c0_i32_0 : i32, i32, i32
  }
  func.func @transform_5(%arg0: i32) -> (i32, i32, i32) {
    %c0_i32 = arith.constant 0 : i32
    %c0_i32_0 = arith.constant 0 : i32
    %c0_i32_1 = arith.constant 0 : i32
    return %arg0, %c0_i32, %c0_i32_0 : i32, i32, i32
  }
  func.func @transform_6(%arg0: i32) -> (i32, i32, i32) {
    %c0_i32 = arith.constant 0 : i32
    %c0_i32_0 = arith.constant 0 : i32
    %c0_i32_1 = arith.constant 0 : i32
    return %arg0, %c0_i32, %c0_i32_0 : i32, i32, i32
  }
  func.func @transform_7(%arg0: i32) -> (i32, i32, i32) {
    %c0_i32 = arith.constant 0 : i32
    %c0_i32_0 = arith.constant 0 : i32
    %c0_i32_1 = arith.constant 0 : i32
    return %arg0, %c0_i32, %c0_i32_0 : i32, i32, i32
  }
  func.func @transform_8(%arg0: i32) -> (i32, i32, i32) {
    %c0_i32 = arith.constant 0 : i32
    %c0_i32_0 = arith.constant 0 : i32
    %c0_i32_1 = arith.constant 0 : i32
    return %arg0, %c0_i32, %c0_i32_0 : i32, i32, i32
  }
  func.func @transform_9(%arg0: i32) -> (i32, i32, i32) {
    %c0_i32 = arith.constant 0 : i32
    %c0_i32_0 = arith.constant 0 : i32
    %c0_i32_1 = arith.constant 0 : i32
    return %arg0, %c0_i32, %c0_i32_0 : i32, i32, i32
  }
  func.func @transform_10(%arg0: i32) -> (i32, i32, i32) {
    %c0_i32 = arith.constant 0 : i32
    %c0_i32_0 = arith.constant 0 : i32
    %c0_i32_1 = arith.constant 0 : i32
    return %arg0, %c0_i32, %c0_i32_0 : i32, i32, i32
  }
  func.func @transform_11(%arg0: i32) -> (i32, i32, i32) {
    %c0_i32 = arith.constant 0 : i32
    %c0_i32_0 = arith.constant 0 : i32
    %c0_i32_1 = arith.constant 0 : i32
    return %arg0, %c0_i32, %c0_i32_0 : i32, i32, i32
  }
  func.func @transform_12(%arg0: i32) -> (i32, i32, i32) {
    %c0_i32 = arith.constant 0 : i32
    %c0_i32_0 = arith.constant 0 : i32
    %c0_i32_1 = arith.constant 0 : i32
    return %arg0, %c0_i32, %c0_i32_0 : i32, i32, i32
  }
  func.func @transform_13(%arg0: i32) -> (i32, i32, i32) {
    %c0_i32 = arith.constant 0 : i32
    %c0_i32_0 = arith.constant 0 : i32
    %c0_i32_1 = arith.constant 0 : i32
    return %arg0, %c0_i32, %c0_i32_0 : i32, i32, i32
  }
  func.func @transform_14(%arg0: i32) -> (i32, i32, i32) {
    %c0_i32 = arith.constant 0 : i32
    %c0_i32_0 = arith.constant 0 : i32
    %c0_i32_1 = arith.constant 0 : i32
    return %arg0, %c0_i32, %c0_i32_0 : i32, i32, i32
  }
  func.func @transform_15(%arg0: i32) -> (i32, i32, i32) {
    %c0_i32 = arith.constant 0 : i32
    %c0_i32_0 = arith.constant 0 : i32
    %c0_i32_1 = arith.constant 0 : i32
    return %arg0, %c0_i32, %c0_i32_0 : i32, i32, i32
  }
  func.func @transform_16(%arg0: i32) -> (i32, i32) {
    %c0_i32 = arith.constant 0 : i32
    %c0_i32_0 = arith.constant 0 : i32
    %c0_i32_1 = arith.constant 0 : i32
    return %c0_i32, %c0_i32_0 : i32, i32
  }
  func.func @transform_17(%arg0: i32) -> (i32, i32) {
    %c0_i32 = arith.constant 0 : i32
    %c0_i32_0 = arith.constant 0 : i32
    %c0_i32_1 = arith.constant 0 : i32
    return %c0_i32, %c0_i32_0 : i32, i32
  }
  func.func @transform_18(%arg0: i32) -> (i32, i32) {
    %c0_i32 = arith.constant 0 : i32
    %c0_i32_0 = arith.constant 0 : i32
    %c0_i32_1 = arith.constant 0 : i32
    return %c0_i32, %c0_i32_0 : i32, i32
  }
}

</mosaic_0001>

<bundles_post_ra>
// kernel: tpu_custom_call.1
= control target key start
LH: loop header
LB: loop body
LE: loop exit
PB: predicated region body
PF: predicated region fallthrough
CT: control target
= control target key end

     0   :  { %s3737_s0 = inlined_call_operand.hbm [shape: f32[16,32], index: 0, kind: input, shape index: {}]   ;;  %s3738_s1 = inlined_call_operand.vmem [shape: f32[2,8], index: 1, kind: input, shape index: {}]   ;;  %s3739_s2 = inlined_call_operand.hbm [shape: f32[1,32], index: 2, kind: input, shape index: {}]   ;;  %s3740_s3 = inlined_call_operand.hbm [shape: f32[1,32], index: 3, kind: input, shape index: {}]   ;;  %s3741_s4 = inlined_call_operand.vmem [shape: f32[2,32,96], index: 4, kind: input, shape index: {}]   ;;  %s3742_s5 = inlined_call_operand.hbm [shape: f32[2,1,96], index: 5, kind: input, shape index: {}]   ;;  %s3743_s6 = inlined_call_operand.vmem [shape: f32[2,32,32], index: 6, kind: input, shape index: {}]   ;;  %s3744_s7 = inlined_call_operand.hbm [shape: f32[2,1,32], index: 7, kind: input, shape index: {}]   ;;  %s3745_s8 = inlined_call_operand.hbm [shape: f32[2,1,32], index: 8, kind: input, shape index: {}]   ;;  %s3746_s9 = inlined_call_operand.hbm [shape: f32[2,1,32], index: 9, kind: input, shape index: {}]   ;;  %s3747_s10 = inlined_call_operand.vmem [shape: f32[2,32,64], index: 10, kind: input, shape index: {}]   ;;  %s3748_s11 = inlined_call_operand.vmem [shape: f32[2,1,64], index: 11, kind: input, shape index: {}]   ;;  %s3749_s12 = inlined_call_operand.vmem [shape: f32[2,64,32], index: 12, kind: input, shape index: {}]   ;;  %s3750_s13 = inlined_call_operand.vmem [shape: f32[2,1,32], index: 13, kind: input, shape index: {}]   ;;  %s3751_s14 = inlined_call_operand.vmem [shape: f32[2,1,32], index: 14, kind: input, shape index: {}]   ;;  %s3752_s15 = inlined_call_operand.vmem [shape: f32[2,1,32], index: 15, kind: input, shape index: {}]   ;;  %s3753_s16 = inlined_call_operand.vmem [shape: f32[32,128], index: 16, kind: input, shape index: {}]   ;;  %s3754_s17 = inlined_call_operand.vmem [shape: f32[1,128], index: 17, kind: input, shape index: {}]   ;;  %s3755_s18 = inlined_call_operand.hbm [shape: f32[16,128], index: 18, kind: output, shape index: {}]  }
   0x1   :  { %3775 = sst [smem:[#allocation24_spill]] %s3737_s0 }
   0x2   :  { %3776 = sst [smem:[#allocation25_spill]] %s3738_s1 }
   0x3   :  { %3777 = sst [smem:[#allocation26_spill]] %s3739_s2 }
   0x4   :  { %3778 = sst [smem:[#allocation27_spill]] %s3741_s4 }
   0x5   :  { %3779 = sst [smem:[#allocation28_spill]] %s3742_s5 }
   0x6   :  { %3780 = sst [smem:[#allocation29_spill]] %s3743_s6 }
   0x7   :  { %3781 = sst [smem:[#allocation30_spill]] %s3745_s8 }
   0x8   :  { %3782 = sst [smem:[#allocation31_spill]] %s3747_s10 }
   0x9   :  { %3783 = sst [smem:[#allocation32_spill]] %s3748_s11 }
   0xa   :  { %3784 = sst [smem:[#allocation33_spill]] %s3749_s12 }
   0xb   :  { %3785 = sst [smem:[#allocation34_spill]] %s3750_s13 }
   0xc   :  { %3786 = sst [smem:[#allocation35_spill]] %s3751_s14 }
   0xd   :  { %3787 = sst [smem:[#allocation36_spill]] %s3752_s15 }
   0xe   :  { %3788 = sst [smem:[#allocation37_spill]] %s3753_s16 }
   0xf   :  { %3789 = sst [smem:[#allocation38_spill]] %s3754_s17 }
  0x10   :  { %3790 = sst [smem:[#allocation39_spill]] %s3755_s18 }
  0x11   :  { %23 = vsyncpa [#allocation4], 0 }
  0x12   :  { %24 = vsyncpa [#allocation7], 0 }
  0x13   :  { %25 = vsyncpa [#allocation10], 0 }
  0x14   :  { %27 = vsyncpa [#allocation10 + $0x1], 0 }
  0x15   :  { %28 = vsyncpa [#allocation13], 0 }
  0x16   :  { %30 = vsyncpa [#allocation13 + $0x1], 0 }
  0x17   :  { %31 = vsyncpa [#allocation5], 0  ;;  %s3202_s27 = smov 0   ;;  %s3204_s28 = smov 0  }
  0x18   :  { %s3206_s29 = smov 0   ;;  %s3208_s30 = smov 0  }
  0x19 LB: > { %3791 = sst [smem:[#allocation21_spill]] %s3081_s29  ;;  %s3221_s0 = sadd.s32 4294967295, %s3085_s30   ;;  %s3085_s30 = sphi %s3208_s30, %s3841_s30   ;;  %s3081_s29 = sphi %s3206_s29, %s3843_s29   ;;  %s3077_s28 = sphi %s3204_s28, %s3845_s28   ;;  %s3073_s27 = sphi %s3202_s27, %s3844_s27  }
  0x1a   : > { %p167_p0 = scmp.ne.s32.totalorder %s3077_s28, %s3073_s27  ;;  %p3762_p1 = scmp.eq.s32.totalorder %s3221_s0, 0 }
  0x1b   : > { %p2404_p2 = scmp.ge.s32.totalorder %s3085_s30, 1  ;;  %p501_p3 = scmp.lt.s32.totalorder %s3085_s30, 3 }
  0x1c   : > { %p3230_p5 = por %p3762_p1, %p167_p0  ;;  %s3087_s20 = smov [#allocation6]  }
  0x1d   : > { %p3234_p6 = pnand %p2404_p2, %p501_p3  ;;  %s530_s21 = sshll.u32 %s3087_s20, 4  ;;  %s531_s21 = int_to_ptr.vmem [resolvable:$true] %s530_s21 }
  0x1e   : > { %s3792_s19 = scalar_select %p3230_p5, 1, 0 }
  0x1f   : > { %s3793_s1 = scalar_select %p3234_p6, 1, 0 }
  0x20   : > { %p2693_p7 = pneg %p3234_p6  ;;  %s3241_s22 = sadd.s32 1, %s3085_s30  }
  0x21   : > { %3794 = sst [smem:[#allocation22_spill]] %s3241_s22  ;;  %s151_s23 = ssub.s32 %s3085_s30, %s3241_s22 }
  0x22   : > { %p3245_p8 = pnand %p2693_p7, %p3762_p1  ;;  %p3251_p9 = scmp.eq.s32.totalorder %s151_s23, 0 }
  0x23   : > { %s154_s25 = sadd.s32 1, %s3081_s29  ;;  %s3797_s20 = sld [smem:[#allocation26_spill]] }
  0x24   : > { %s3795_s2 = scalar_select %p3245_p8, 1, 0 }
  0x25   : > { %s3796_s24 = scalar_select %p3251_p9, 1, 0 }
  0x26   : > { %p3266_p12 = pneg %p3245_p8 }
  0x28   : > { %s3798_s15 = scalar_select %p3266_p12, 1, 0 }
  0x29   : > { %s2805_s18 = scalar_lea.hbm %s3797_s20, 16 }
  0x2a   : > { %p2806_p11 = scmp.ne.s32.totalorder %s3797_s20, %s2805_s18  ;;  %p2812_p2 = scmp.lt.u32.totalorder %s2805_s18, %s3797_s20 }
  0x2c   : > { %p2808_p13 = pnand %p3266_p12, %p2806_p11 }
  0x2e   : > { %p2809_p0 = pneg %p2808_p13 }
  0x30   : > { %p2814_p3 = pnand %p2812_p2, %p2809_p0 }
  0x32   : > { %2817 = shalt.err (!%p2814_p3)
}
  0x33   : > { %s2818_s26 = scalar_lea.vmem %s531_s21, 16  ;;  %s2825_s16 = scalar_lea.vmem %s531_s21, 32 }
  0x34   : > { %p2819_p7 = scmp.ne.s32.totalorder %s531_s21, %s2818_s26  ;;  %p2826_p10 = scmp.lt.s32.totalorder %s531_s21, %s531_s21 }
  0x35   : > { %p2827_p5 = scmp.lt.s32.totalorder %s2825_s16, %s2818_s26 }
  0x36   : > { %p2821_p4 = pnand %p2819_p7, %p3266_p12 }
  0x37   : > { %p2828_p6 = por %p2827_p5, %p2826_p10 }
  0x38   : > { %p2822_p1 = pneg %p2821_p4 }
  0x3a   : > { %p2829_p9 = pnand %p2828_p6, %p2822_p1 }
  0x3c   : > { %2832 = shalt.err (!%p2829_p9)
}
  0x3d   : > { %2699 = dma.hbm_to_vmem [thread:$0]  (!%p3245_p8), %s3797_s20, 16, %s531_s21, [#allocation7]  }
  0x3e   : > { %p3799_p4 = scmp.ne.s32.totalorder %s3796_s24, 0  ;;  %p162_p1 = scmp.eq.s32.totalorder %s3085_s30, 0 }
  0x3f   : > { %p2719_p5 = scmp.lt.s32.totalorder %s3085_s30, 2  ;;  %s3291_s23 = sand.u32 1, %s3081_s29  }
  0x40   : > { %s3285_s18 = scalar_select %p3799_p4, %s3081_s29, %s154_s25  }
  0x41   : > { %p3801_p6 = scmp.ne.s32.totalorder %s3081_s29, %s3077_s28  ;;  %s3297_s26 = sshll.u32 %s3085_s30, 4 }
  0x42   : > { %3800 = sst [smem:[#allocation23_spill]] %s3285_s18  ;;  %s3802_s5 = sld [smem:[#allocation28_spill]] }
  0x43   : > { %p163_p9 = por %p162_p1, %p3801_p6  ;;  %s569_s21 = scalar_lea.vmem [#allocation9], %s3291_s23 }
  0x44   : > { %s576_s24 = sshll.u32 %s569_s21, 4  ;;  %s3804_s8 = sld [smem:[#allocation30_spill]]  ;;  %s3306_s24 = int_to_ptr.vmem [resolvable:$true] %s576_s24 }
  0x45   : > { %p3308_p10 = pnand %p2719_p5, %p163_p9  ;;  %s3805_s17 = sand.u32 1, %s3085_s30  }
  0x46   : > { %s3320_s18 = scalar_lea.sflag [#allocation10], %s3805_s17 }
  0x47   : > { %s3803_s25 = scalar_select %p3308_p10, 1, 0 }
  0x48   : > { %s3303_s27 = scalar_lea.hbm %s3802_s5, %s3297_s26  ;;  %p3326_p13 = pneg %p3308_p10 }
  0x49   : > { %s2833_s29 = scalar_lea.hbm %s3303_s27, 16  ;;  %s2838_s20 = scalar_lea.hbm %s3802_s5, 32 }
  0x4a   : > { %s3316_s16 = scalar_lea.hbm %s3804_s8, %s3297_s26  ;;  %p2834_p11 = scmp.ne.s32.totalorder %s3303_s27, %s2833_s29 }
  0x4b   : > { %s3806_s21 = scalar_select %p3326_p13, 1, 0 }
  0x4c   : > { %p2836_p0 = pnand %p3326_p13, %p2834_p11  ;;  %p2839_p3 = scmp.lt.u32.totalorder %s3303_s27, %s3802_s5 }
  0x4d   : > { %p2840_p7 = scmp.lt.u32.totalorder %s2838_s20, %s2833_s29  ;;  %p2842_p1 = scmp.lt.u32.totalorder %s2833_s29, %s3303_s27 }
  0x4e   : > { %p2837_p2 = pneg %p2836_p0 }
  0x4f   : > { %p2841_p4 = por %p2840_p7, %p2839_p3 }
  0x51   : > { %p2843_p5 = por %p2842_p1, %p2841_p4 }
  0x53   : > { %p2844_p6 = pnand %p2843_p5, %p2837_p2 }
  0x55   : > { %2847 = shalt.err (!%p2844_p6)
}
  0x56   : > { %s2848_s17 = scalar_lea.vmem %s3306_s24, 16  ;;  %s3088_s13 = smov [#allocation9]  }
  0x57   : > { %p2849_p9 = scmp.ne.s32.totalorder %s3306_s24, %s2848_s17  ;;  %s2853_s14 = sshll.u32 %s3088_s13, 4  ;;  %s2854_s14 = int_to_ptr.vmem [resolvable:$false] %s2853_s14 }
  0x58   : > { %s2855_s12 = scalar_lea.vmem %s2854_s14, 32  ;;  %p2856_p8 = scmp.lt.s32.totalorder %s3306_s24, %s2854_s14 }
  0x59   : > { %p2851_p11 = pnand %p2849_p9, %p3326_p13  ;;  %p2857_p12 = scmp.lt.s32.totalorder %s2855_s12, %s2848_s17 }
  0x5b   : > { %p2852_p0 = pneg %p2851_p11  ;;  %p2858_p3 = por %p2857_p12, %p2856_p8 }
  0x5d   : > { %p2859_p7 = pnand %p2858_p3, %p2852_p0 }
  0x5f   : > { %2862 = shalt.err (!%p2859_p7)
}
  0x60   : > { %2706 = dma.hbm_to_vmem [thread:$0]  (!%p3308_p10), %s3303_s27, 16, %s3306_s24, %s3320_s18  }
  0x61   : > { %s611_s29 = scalar_lea.vmem [#allocation12], %s3291_s23  ;;  %s3089_s22 = smov [#allocation3]  }
  0x62   : > { %s618_s20 = sshll.u32 %s611_s29, 4  ;;  %s3353_s17 = sshll.u32 %s3089_s22, 4  ;;  %s3351_s20 = int_to_ptr.vmem [resolvable:$true] %s618_s20  ;;  %s514_s17 = int_to_ptr.vmem [resolvable:$true] %s3353_s17 }
  0x63   : > { %s3807_s13 = sand.u32 1, %s3085_s30   ;;  %s2863_s12 = scalar_lea.hbm %s3316_s16, 16 }
  0x64   : > { %s3357_s14 = scalar_lea.sflag [#allocation13], %s3807_s13  ;;  %p2864_p8 = scmp.ne.s32.totalorder %s3316_s16, %s2863_s12 }
  0x65   : > { %s2868_s6 = scalar_lea.hbm %s3804_s8, 32  ;;  %p2869_p4 = scmp.lt.u32.totalorder %s3316_s16, %s3804_s8 }
  0x66   : > { %p2866_p12 = pnand %p2864_p8, %p3326_p13  ;;  %p2870_p1 = scmp.lt.u32.totalorder %s2868_s6, %s2863_s12 }
  0x67   : > { %p2872_p6 = scmp.lt.u32.totalorder %s2863_s12, %s3316_s16 }
  0x68   : > { %p2867_p2 = pneg %p2866_p12  ;;  %p2871_p5 = por %p2870_p1, %p2869_p4 }
  0x6a   : > { %p2873_p9 = por %p2872_p6, %p2871_p5 }
  0x6c   : > { %p2874_p11 = pnand %p2873_p9, %p2867_p2 }
  0x6e   : > { %2877 = shalt.err (!%p2874_p11)
}
  0x6f   : > { %s2878_s30 = scalar_lea.vmem %s3351_s20, 16  ;;  %s3090_s5 = smov [#allocation12]  }
  0x70   : > { %p2879_p0 = scmp.ne.s32.totalorder %s3351_s20, %s2878_s30  ;;  %s2883_s10 = sshll.u32 %s3090_s5, 4  ;;  %s2884_s10 = int_to_ptr.vmem [resolvable:$false] %s2883_s10 }
  0x71   : > { %s2885_s29 = scalar_lea.vmem %s2884_s10, 32  ;;  %p2886_p8 = scmp.lt.s32.totalorder %s3351_s20, %s2884_s10 }
  0x72   : > { %p2881_p3 = pnand %p2879_p0, %p3326_p13  ;;  %p2887_p12 = scmp.lt.s32.totalorder %s2885_s29, %s2878_s30 }
  0x74   : > { %p2882_p7 = pneg %p2881_p3  ;;  %p2888_p4 = por %p2887_p12, %p2886_p8 }
  0x76   : > { %p2889_p1 = pnand %p2888_p4, %p2882_p7 }
  0x78   : > { %2892 = shalt.err (!%p2889_p1)
}
  0x79   : > { %2712 = dma.hbm_to_vmem [thread:$0]  (!%p3308_p10), %s3316_s16, 16, %s3351_s20, %s3357_s14  }
  0x7a   : > { %s3808_s13 = sld [smem:[#allocation24_spill]]  ;;  %p3809_p5 = scmp.ne.s32.totalorder %s3798_s15, 0 }
  0x80   : > { %s2893_s12 = scalar_lea.hbm %s3808_s13, 256 }
  0x81   : > { %p2894_p2 = scmp.ne.s32.totalorder %s3808_s13, %s2893_s12  ;;  %p2900_p11 = scmp.lt.u32.totalorder %s2893_s12, %s3808_s13 }
  0x83   : > { %p2896_p6 = pnand %p2894_p2, %p3809_p5 }
  0x85   : > { %p2897_p9 = pneg %p2896_p6 }
  0x87   : > { %p2902_p0 = pnand %p2900_p11, %p2897_p9 }
  0x89   : > { %2905 = shalt.err (!%p2902_p0)
}
  0x8a   : > { %s2906_s10 = scalar_lea.vmem %s514_s17, 256  ;;  %p2914_p12 = scmp.lt.s32.totalorder %s514_s17, %s514_s17 }
  0x8b   : > { %p2907_p3 = scmp.ne.s32.totalorder %s514_s17, %s2906_s10  ;;  %p2915_p4 = scmp.lt.s32.totalorder %s2906_s10, %s2906_s10 }
  0x8d   : > { %p2909_p7 = pnand %p2907_p3, %p3809_p5  ;;  %p2916_p1 = por %p2915_p4, %p2914_p12 }
  0x8f   : > { %p2910_p8 = pneg %p2909_p7 }
  0x91   : > { %p2917_p10 = pnand %p2916_p1, %p2910_p8 }
  0x93   : > { %2920 = shalt.err (!%p2917_p10)
}
  0x94   : > { %s3091_s16 = smov 128   ;;  %s3092_s20 = smov 8  }
  0x95   : > { %p3810_p2 = scmp.ne.s32.totalorder %s3795_s2, 0  ;;  %s3093_s22 = smov [#allocation8]  }
  0x96   : > { %s541_s12 = sshll.u32 %s3093_s22, 4  ;;  %s3404_s30 = scalar_lea.hbm %s3744_s7, %s3297_s26  ;;  %s542_s12 = int_to_ptr.vmem [resolvable:$true] %s541_s12 }
  0x97   : > { %2696 = dma.hbm_to_vmem [thread:$0]  (!%p3810_p2), %s3808_s13, 256, %s514_s17, [#allocation4], %s3091_s16, %s3091_s16, %s3092_s20  }
  0x98   : > { %s2921_s8 = scalar_lea.hbm %s3740_s3, 16 }
  0x99   : > { %p2922_p10 = scmp.ne.s32.totalorder %s3740_s3, %s2921_s8  ;;  %p2928_p11 = scmp.lt.u32.totalorder %s2921_s8, %s3740_s3 }
  0x9b   : > { %p2924_p6 = pnand %p2922_p10, %p3809_p5 }
  0x9d   : > { %p2925_p9 = pneg %p2924_p6 }
  0x9f   : > { %p2930_p0 = pnand %p2928_p11, %p2925_p9 }
  0xa1   : > { %2933 = shalt.err (!%p2930_p0)
}
  0xa2   : > { %s2934_s20 = scalar_lea.vmem %s542_s12, 16  ;;  %s2941_s29 = scalar_lea.vmem %s542_s12, 32 }
  0xa3   : > { %p2935_p3 = scmp.ne.s32.totalorder %s542_s12, %s2934_s20  ;;  %p2942_p12 = scmp.lt.s32.totalorder %s542_s12, %s542_s12 }
  0xa4   : > { %p2943_p4 = scmp.lt.s32.totalorder %s2941_s29, %s2934_s20 }
  0xa5   : > { %p2937_p7 = pnand %p2935_p3, %p3809_p5 }
  0xa6   : > { %p2944_p1 = por %p2943_p4, %p2942_p12 }
  0xa7   : > { %p2938_p8 = pneg %p2937_p7 }
  0xa9   : > { %p2945_p13 = pnand %p2944_p1, %p2938_p8 }
  0xab   : > { %2948 = shalt.err (!%p2945_p13)
}
  0xac   : > { %2702 = dma.hbm_to_vmem [thread:$0]  (!%p3810_p2), %s3740_s3, 16, %s542_s12, [#allocation7]  }
  0xad   : > { %s594_s8 = scalar_lea.vmem [#allocation11], %s3291_s23  ;;  %s3429_s27 = scalar_lea.hbm %s3746_s9, %s3297_s26 }
  0xae   : > { %s601_s15 = sshll.u32 %s594_s8, 4  ;;  %s2949_s2 = scalar_lea.hbm %s3404_s30, 16  ;;  %s602_s15 = int_to_ptr.vmem [resolvable:$true] %s601_s15 }
  0xaf   : > { %p2950_p13 = scmp.ne.s32.totalorder %s3404_s30, %s2949_s2  ;;  %p3811_p5 = scmp.ne.s32.totalorder %s3806_s21, 0 }
  0xb0   : > { %s2954_s10 = scalar_lea.hbm %s3744_s7, 32  ;;  %p2955_p2 = scmp.lt.u32.totalorder %s3404_s30, %s3744_s7 }
  0xb1   : > { %p2952_p10 = pnand %p2950_p13, %p3811_p5  ;;  %p2956_p9 = scmp.lt.u32.totalorder %s2954_s10, %s2949_s2 }
  0xb2   : > { %p2958_p0 = scmp.lt.u32.totalorder %s2949_s2, %s3404_s30 }
  0xb3   : > { %p2953_p6 = pneg %p2952_p10  ;;  %p2957_p11 = por %p2956_p9, %p2955_p2 }
  0xb5   : > { %p2959_p3 = por %p2958_p0, %p2957_p11 }
  0xb7   : > { %p2960_p7 = pnand %p2959_p3, %p2953_p6 }
  0xb9   : > { %2963 = shalt.err (!%p2960_p7)
}
  0xba   : > { %s2964_s26 = scalar_lea.vmem %s602_s15, 16  ;;  %s3094_s12 = smov [#allocation11]  }
  0xbb   : > { %p2965_p8 = scmp.ne.s32.totalorder %s602_s15, %s2964_s26  ;;  %s2969_s20 = sshll.u32 %s3094_s12, 4  ;;  %s2970_s20 = int_to_ptr.vmem [resolvable:$false] %s2969_s20 }
  0xbc   : > { %s2971_s29 = scalar_lea.vmem %s2970_s20, 32  ;;  %p2972_p1 = scmp.lt.s32.totalorder %s602_s15, %s2970_s20 }
  0xbd   : > { %p2967_p12 = pnand %p2965_p8, %p3811_p5  ;;  %p2973_p13 = scmp.lt.s32.totalorder %s2971_s29, %s2964_s26 }
  0xbf   : > { %p2968_p4 = pneg %p2967_p12  ;;  %p2974_p10 = por %p2973_p13, %p2972_p1 }
  0xc1   : > { %p2975_p2 = pnand %p2974_p10, %p2968_p4 }
  0xc3   : > { %2978 = shalt.err (!%p2975_p2)
}
  0xc4   : > { %p3812_p9 = scmp.ne.s32.totalorder %s3803_s25, 0  ;;  %s628_s4 = scalar_lea.vmem [#allocation14], %s3291_s23 }
  0xc5   : > { %s635_s11 = sshll.u32 %s628_s4, 4  ;;  %s2979_s8 = scalar_lea.hbm %s3429_s27, 16  ;;  %s636_s11 = int_to_ptr.vmem [resolvable:$true] %s635_s11 }
  0xc6   : > { %2709 = dma.hbm_to_vmem [thread:$0]  (!%p3812_p9), %s3404_s30, 16, %s602_s15, %s3320_s18  }
  0xc7   : > { %p2980_p6 = scmp.ne.s32.totalorder %s3429_s27, %s2979_s8  ;;  %s2984_s2 = scalar_lea.hbm %s3746_s9, 32 }
  0xc8   : > { %p2985_p3 = scmp.lt.u32.totalorder %s3429_s27, %s3746_s9  ;;  %p2986_p7 = scmp.lt.u32.totalorder %s2984_s2, %s2979_s8 }
  0xc9   : > { %p2982_p11 = pnand %p2980_p6, %p3811_p5  ;;  %p2988_p12 = scmp.lt.u32.totalorder %s2979_s8, %s3429_s27 }
  0xca   : > { %p2987_p8 = por %p2986_p7, %p2985_p3 }
  0xcb   : > { %p2983_p0 = pneg %p2982_p11 }
  0xcc   : > { %p2989_p4 = por %p2988_p12, %p2987_p8 }
  0xce   : > { %p2990_p1 = pnand %p2989_p4, %p2983_p0 }
  0xd0   : > { %2993 = shalt.err (!%p2990_p1)
}
  0xd1   : > { %s2994_s18 = scalar_lea.vmem %s636_s11, 16  ;;  %s3095_s23 = smov [#allocation14]  }
  0xd2   : > { %p2995_p13 = scmp.ne.s32.totalorder %s636_s11, %s2994_s18  ;;  %s2999_s30 = sshll.u32 %s3095_s23, 4  ;;  %s3000_s30 = int_to_ptr.vmem [resolvable:$false] %s2999_s30 }
  0xd3   : > { %s3001_s15 = scalar_lea.vmem %s3000_s30, 32  ;;  %p3002_p6 = scmp.lt.s32.totalorder %s636_s11, %s3000_s30 }
  0xd4   : > { %p2997_p10 = pnand %p2995_p13, %p3811_p5  ;;  %p3003_p11 = scmp.lt.s32.totalorder %s3001_s15, %s2994_s18 }
  0xd6   : > { %p2998_p2 = pneg %p2997_p10  ;;  %p3004_p9 = por %p3003_p11, %p3002_p6 }
  0xd8   : > { %p3005_p3 = pnand %p3004_p9, %p2998_p2 }
  0xda   : > { %3008 = shalt.err (!%p3005_p3)
}
  0xdb   : > { %p3813_p7 = scmp.ne.s32.totalorder %s3803_s25, 0  ;;  %p3814_p0 = scmp.ne.s32.totalorder %s3793_s1, 0 }
  0xdc   : > { %p3815_p5 = scmp.eq.s32.totalorder (!%p3814_p0), %s3221_s0, 0 }
  0xdd   : > { %2715 = dma.hbm_to_vmem [thread:$0]  (!%p3813_p7), %s3429_s27, 16, %s636_s11, %s3357_s14  }
  0xde   : > { %684 = sbr.rel (%p3814_p0) target bundleno = 3335 (0xd07), region = 92 }
  0xe5   : > { %3052 = dma.done.wait (%p3815_p5), [#allocation4], 256   ;;  %p3816_p8 = pmov %p3815_p5 }
  0xe6   : > { %p3817_p12 = pmov %p3815_p5 }
  0xe7   : > { %3054 = vsyncadd (%p3816_p8), [#allocation4], 4294967040 }
  0xe8   : > { %3056 = dma.done.wait (%p3817_p12), [#allocation7], 32   ;;  %p3818_p9 = pmov %p3815_p5 }
  0xe9   : > { %s698_s25 = sand.u32 1, %s3221_s0   ;;  %s3480_s21 = sand.u32 1, %s3077_s28  }
  0xea   : > { %3058 = vsyncadd (%p3818_p9), [#allocation7], 4294967264  ;;  %s699_s1 = scalar_lea.sflag [#allocation10], %s698_s25  ;;  %p3819_p4 = scmp.ne.s32.totalorder %s3792_s19, 0 }
  0xec   : > { %3060 = dma.done.wait (%p3819_p4), %s699_s1, 32  }
  0xed   : > { %3062 = vsyncadd (%p3819_p4), %s699_s1, 4294967264  ;;  %s715_s10 = scalar_lea.sflag [#allocation13], %s698_s25 }
  0xee   : > { %3064 = dma.done.wait (%p3819_p4), %s715_s10, 32  }
  0xef   : > { %3066 = vsyncadd (%p3819_p4), %s715_s10, 4294967264  ;;  %p816_p1 = scmp.lt.s32.totalorder %s3221_s0, 1  ;;  %s3821_s8 = sld [smem:[#allocation27_spill]] }
  0xf0   : > { %s3822_s24 = sld [smem:[#allocation29_spill]]  ;;  %s3823_s30 = sld [smem:[#allocation31_spill]] }
  0xf1   : > { %s3495_s16 = scalar_select %p816_p1, %s3221_s0, 1 }
  0xf2   : > { %s3824_s12 = sld [smem:[#allocation33_spill]]  ;;  %s3825_s19 = sld [smem:[#allocation34_spill]] }
  0xf3   : > { %s2464_s26 = sshll.u32 %s3495_s16, 5  ;;  %s2467_s25 = sshll.u32 %s3495_s16, 6 }
  0xf4   : > { %s3826_s22 = sld [smem:[#allocation35_spill]]  ;;  %s3827_s14 = sld [smem:[#allocation36_spill]] }
  0xf5   : > { %s3505_s6 = scalar_lea.vmem %s3821_s8, %s2464_s26  ;;  %p3828_p13 = scmp.ne.s32.totalorder %s3221_s0, 0 }
  0xf6   : > { %s3510_s5 = scalar_lea.vmem %s3822_s24, %s2464_s26  ;;  %s3515_s15 = scalar_lea.vmem %s3823_s30, %s2464_s26  ;;  %v852_v0 = vld [vmem:[#allocation3] sm:$0xff] (!%p3828_p13)  ;;  %vm856_vm0 = vcmask (!%p3828_p13), 261120   ;;  %v853_v1 = vld [vmem:[#allocation3 + $0x8] sm:$0xff] (!%p3828_p13)  ;;  %v2426_v21 = vld [vmem:[#allocation6] ss:$0 sm:$0xff] (!%p3828_p13) }
  0xf7   : > { %s725_s26 = scalar_lea.vmem [#allocation14], %s3480_s21  ;;  %851 = sbr.rel (%p3828_p13) target bundleno = 565 (0x235), region = 124  ;;  %v857_v2 = vsel (!%p3828_p13), %vm856_vm0, %v852_v0, 0.0  ;;  %v860_v3 = vsel (!%p3828_p13), %vm856_vm0, %v853_v1, 0.0  ;;  %v2427_v23 = vld [vmem:[#allocation8] ss:$0 sm:$0xff] (!%p3828_p13) }
  0xf8   : > { %s3521_s20 = scalar_lea.vmem %s3824_s12, %s2467_s25  ;;  %s841_s8 = scalar_lea.vmem %s3825_s19, %s3495_s16  ;;  %858 = vadd.xlane.f32.xlu0 (!%p3828_p13), %v857_v2 }
  0xfa   : > { %s844_s2 = scalar_lea.vmem %s3826_s22, %s3495_s16  ;;  %s847_s18 = scalar_lea.vmem %s3827_s14, %s3495_s16 }
  0xfc   : > { %861 = vadd.xlane.f32.xlu0 (!%p3828_p13), %v860_v3 }
 0x185   : > { %v859_v4 = vpop.xlane.xlu0 %858 }
 0x186   : > { %v864_v5 = vmul.f32 0.03125, %v859_v4 }
 0x188   : > { %v866_v6 = vsub.f32 %v852_v0, %v864_v5 }
 0x189   : > { %v862_v7 = vpop.xlane.xlu0 %861 }
 0x18a   : > { %v865_v8 = vmul.f32 0.03125, %v862_v7  ;;  %v868_v9 = vmul.f32 %v866_v6, %v866_v6 }
 0x18c   : > { %v867_v10 = vsub.f32 %v853_v1, %v865_v8  ;;  %v870_v11 = vsel %vm856_vm0, %v868_v9, 0.0 }
 0x18d   : > { %871 = vadd.xlane.f32.xlu1 %v870_v11 }
 0x18e   : > { %v869_v12 = vmul.f32 %v867_v10, %v867_v10 }
 0x190   : > { %v873_v13 = vsel %vm856_vm0, %v869_v12, 0.0 }
 0x191   : > { %874 = vadd.xlane.f32.xlu1 %v873_v13 }
 0x21a   : > { %v872_v14 = vpop.xlane.xlu1 %871 }
 0x21b   : > { %v876_v15 = vmul.f32 0.03125, %v872_v14 }
 0x21d   : > { %v878_v16 = vadd.f32 1e-12, %v876_v15 }
 0x21e   : > { %v875_v17 = vpop.xlane.xlu1 %874 }
 0x21f   : > { %2773 = vrsqrt.f32 %v878_v16  ;;  %v877_v18 = vmul.f32 0.03125, %v875_v17 }
 0x221   : > { %v879_v19 = vadd.f32 1e-12, %v877_v18 }
 0x223   : > { %2775 = vrsqrt.f32 %v879_v19 }
 0x229   : > { %v2774_v20 = vpop.eup %2773 }
 0x22a   : > { %v882_v22 = vmul.f32 %v2774_v20, %v866_v6 }
 0x22c   : > { %v890_v24 = vmul.f32 %v2426_v21, %v882_v22 }
 0x22d   : > { %v2776_v25 = vpop.eup %2775 }
 0x22e   : > { %v898_v26 = vadd.f32 %v2427_v23, %v890_v24  ;;  %v883_v27 = vmul.f32 %v2776_v25, %v867_v10 }
 0x230   : > { %900 = vst.msk [vmem:[#allocation2] sm:$0xff] %vm856_vm0, %v898_v26  ;;  %v891_v28 = vmul.f32 %v2426_v21, %v883_v27 }
 0x232   : > { %v899_v29 = vadd.f32 %v2427_v23, %v891_v28 }
 0x234   : > { %901 = vst.msk [vmem:[#allocation2 + $0x8] sm:$0xff] %vm856_vm0, %v899_v29 }
 0x235 PF: > { %v904_v30 = vld [vmem:[%s3505_s6] sm:$0xff]  ;;  %v905_v31 = vld [vmem:[%s3505_s6 + $0x8] sm:$0xff]  ;;  %v906_v32 = vld [vmem:[%s3505_s6 + $0x10] sm:$0xff]  ;;  %vm915_vm1 = vcmask 261120   ;;  %v3096_v38 = vmov 0.0   ;;  %vm3097_vm2 = vmmov 0   ;;  %v1079_v50 = vlaneseq }
 0x236   : > { %v2621_v33 = vpack.c.bf16 %v905_v31, %v904_v30  ;;  %v907_v34 = vld [vmem:[%s3505_s6 + $0x18] sm:$0xff]  ;;  %2539 = vmatprep.subr.mxu0 %v3096_v38  ;;  %2541 = vmatprep.mubr.msk.f32.mxu0 %vm3097_vm2, %v3096_v38  ;;  %s3829_s14 = scalar_lea.vmem [#allocation9], %s3480_s21  ;;  %s3098_s27 = smov 112   ;;  %vm1003_vm3 = vcmask 130048   ;;  %vm1084_vm4 = vcmask 64512   ;;  %vm1950_vm5 = vcmask 523264  }
 0x237   : > { %v3548_v35 = vld [vmem:[#allocation2] sm:$0xff]  ;;  %v2625_v36 = vpack.c.bf16 %v907_v34, %v906_v32  ;;  %s3099_s17 = smov 96   ;;  %s3100_s4 = smov 80   ;;  %v1080_v53 = vshrl.u32 %v1079_v50, 7 }
 0x238   : > { %2526 = vmatprep.mubr.msk.f32.mxu1 %vm915_vm1, %v3548_v35  ;;  %2622 = vmatprep.subr.bf16.mxu1 %v2621_v33  ;;  %v2428_v39 = vld [vmem:[%s3829_s14] ss:$0 sm:$0xff]  ;;  %s3830_s30 = sld [smem:[#allocation25_spill]]  ;;  %s3101_s25 = smov 64  }
 0x239   : > { %2624 = vmatpush3.bf16.msra.mxu1 %v2621_v33  ;;  %v1081_v55 = vsub.s32 0, %v1080_v53  ;;  %v1424_v61 = vsub.s32 1, %v1080_v53  ;;  %s3102_s1 = smov 48   ;;  %s3103_s10 = smov 16  }
 0x23a   : > { %2626 = vmatprep.subr.bf16.mxu1 %v2625_v36  ;;  %s3832_s12 = scalar_lea.vmem [#allocation12], %s3480_s21  ;;  %s3833_s29 = sld [smem:[#allocation32_spill]] }
 0x23b   : > { %v3552_v37 = vld [vmem:[#allocation2 + $0x8] sm:$0xff]  ;;  %p2456_p10 = scmp.ne.s32.totalorder %s3221_s0, 1 }
 0x23c   : > { %s3838_s6 = sld [smem:[#allocation37_spill]] (!%p2456_p10) }
 0x23d   : > { %2628 = vmatpush3.bf16.msra.mxu1 %v2625_v36 }
 0x23e   : > { %2529 = vmatprep.subr.mxu1 %v3096_v38  ;;  %v997_v51 = vld [vmem:[%s3830_s30] sm:$0x3] }
 0x23f   : > { %v998_v52 = vsub.f32 1.0, %v997_v51 }
 0x240   : > { %2527 = vmatmul.mubr.msk.f32.vlgmr.msra.gmra.mrb[0].mxu1 %vm915_vm1, %v3552_v37  ;;  %s3834_s11 = scalar_lea.vmem %s3833_s29, %s3495_s16 }
 0x241   : > { %2531 = vmatprep.mubr.msk.f32.mxu1 %vm3097_vm2, %v3096_v38  ;;  %v999_v54 = vmul.f32 -1e+09, %v998_v52 }
 0x243   : > { %v1082_v56 = vrot.slane %v999_v54, %v1081_v55  ;;  %v1425_v3 = vrot.slane %v999_v54, %v1424_v61  ;;  %v1686_v54 = vld [vmem:[%s3510_s5] sm:$0xff]  ;;  %v1687_v55 = vld [vmem:[%s3510_s5 + $0x8] sm:$0xff] }
 0x313   : > { %v2528_v40 = vpop.f32.mrb[0].mxu1 }
 0x314   : > { %v988_v41 = vpop.f32.mrb[1].mxu1  ;;  %v3568_v43 = vadd.f32 %v2528_v40, %v2428_v39 }
 0x315   : > { %v3564_v42 = vadd.f32 %v2428_v39, %v988_v41 }
 0x317   : > { %1172 = vrot.lane.b32.xlu1 %v3564_v42, %s3098_s27  ;;  %1001 = vrot.lane.b32.xlu0 %v3564_v42, %s3099_s17 }
 0x31b   : > { %1345 = vrot.lane.b32.xlu1 %v3568_v43, %s3099_s17  ;;  %1174 = vrot.lane.b32.xlu0 %v3564_v42, %s3100_s4 }
 0x31f   : > { %1514 = vrot.lane.b32.xlu1 %v3568_v43, %s3098_s27  ;;  %1516 = vrot.lane.b32.xlu0 %v3568_v43, %s3100_s4 }
 0x389   : > { %v1002_v44 = vpop.permute.xlu0 %1001  ;;  %v1173_v45 = vpop.permute.xlu1 %1172 }
 0x38a   : > { %2530 = vmatpush3.xpose.msk.msra.mxu1 %vm1003_vm3, %v1002_v44 }
 0x38b   : > { %2534 = vmatprep.subr.mxu1 %v3096_v38 }
 0x38d   : > { %2532 = vmatmul.mubr.msk.f32.vlgmr.msra.gmra.mrb[2].mxu1 %vm1003_vm3, %v3564_v42  ;;  %v1175_v46 = vpop.permute.xlu0 %1174  ;;  %v1346_v47 = vpop.permute.xlu1 %1345 }
 0x38e   : > { %2540 = vmatpush3.xpose.msk.msra.mxu0 %vm1003_vm3, %v1175_v46  ;;  %2536 = vmatprep.mubr.msk.f32.mxu1 %vm3097_vm2, %v3096_v38 }
 0x38f   : > { %2549 = vmatprep.subr.mxu0 %v3096_v38 }
 0x391   : > { %2542 = vmatmul.mubr.msk.f32.vlgmr.msra.gmra.mrb[0].mxu0 %vm1003_vm3, %v1173_v45  ;;  %v1517_v48 = vpop.permute.xlu0 %1516  ;;  %v1515_v49 = vpop.permute.xlu1 %1514 }
 0x392   : > { %2550 = vmatpush3.xpose.msk.msra.mxu0 %vm1003_vm3, %v1346_v47  ;;  %2551 = vmatprep.mubr.msk.f32.mxu0 %vm3097_vm2, %v3096_v38 }
 0x393   : > { %2559 = vmatprep.subr.mxu0 %v3096_v38 }
 0x395   : > { %2552 = vmatmul.mubr.msk.f32.vlgmr.msra.gmra.mrb[2].mxu0 %vm1003_vm3, %v3568_v43 }
 0x396   : > { %2560 = vmatpush3.xpose.msk.msra.mxu0 %vm1003_vm3, %v1517_v48  ;;  %2561 = vmatprep.mubr.msk.f32.mxu0 %vm3097_vm2, %v3096_v38 }
 0x399   : > { %2562 = vmatmul.mubr.msk.f32.vlgmr.msra.gmra.mrb[4].mxu0 %vm1003_vm3, %v1515_v49 }
 0x460   : > { %v1074_v57 = vpop.f32.mrb[2].mxu1 }
 0x461   : > { %v1078_v58 = vmul.f32 0.25, %v1074_v57  ;;  %v2533_v59 = vpop.f32.mrb[3].mxu1  ;;  %v1688_v57 = vld [vmem:[%s3510_s5 + $0x10] sm:$0xff] }
 0x463   : > { %v1083_v60 = vadd.f32 %v1082_v56, %v1078_v58  ;;  %v1689_v58 = vld [vmem:[%s3510_s5 + $0x18] sm:$0xff]  ;;  %s3831_s5 = scalar_lea.vmem [#allocation11], %s3480_s21 }
 0x464   : > { %v1246_v62 = vpop.f32.mrb[0].mxu0  ;;  %v2633_v59 = vpack.c.bf16 %v1689_v58, %v1688_v57  ;;  %v1941_v58 = vld [vmem:[%s3521_s20 + $0x30] sm:$0xff] }
 0x465   : > { %v1250_v63 = vmul.f32 0.25, %v1246_v62  ;;  %v2543_v0 = vpop.f32.mrb[1].mxu0  ;;  %v1085_v1 = vsel %vm1084_vm4, %v1083_v60, -inf }
 0x466   : > { %1086 = vmax.xlane.f32.xlu0 %v1085_v1 }
 0x467   : > { %v1251_v2 = vadd.f32 %v1250_v63, %v1082_v56  ;;  %v2629_v56 = vpack.c.bf16 %v1687_v55, %v1686_v54  ;;  %v1939_v55 = vld [vmem:[%s3521_s20 + $0x20] sm:$0xff] }
 0x468   : > { %v1417_v4 = vpop.f32.mrb[2].mxu0 }
 0x469   : > { %v1421_v5 = vmul.f32 0.25, %v1417_v4  ;;  %v2553_v6 = vpop.f32.mrb[3].mxu0  ;;  %v1252_v7 = vsel %vm1084_vm4, %v1251_v2, -inf  ;;  %2630 = vmatprep.subr.bf16.mxu0 %v2629_v56 }
 0x46a   : > { %1253 = vmax.xlane.f32.xlu1 %v1252_v7  ;;  %2632 = vmatpush3.bf16.msra.mxu0 %v2629_v56  ;;  %v2443_v7 = vld [vmem:[%s3831_s5] ss:$0 sm:$0xff]  ;;  %v1940_v56 = vld [vmem:[%s3521_s20 + $0x28] sm:$0xff] }
 0x46b   : > { %v1426_v8 = vadd.f32 %v1425_v3, %v1421_v5  ;;  %2634 = vmatprep.subr.bf16.mxu0 %v2633_v59  ;;  %v2653_v57 = vpack.c.bf16 %v1940_v56, %v1939_v55  ;;  %v2084_v55 = vld [vmem:[%s3838_s6] sm:$0xff] (!%p2456_p10)  ;;  %v2085_v56 = vld [vmem:[%s3838_s6 + $0x8] sm:$0xff] (!%p2456_p10) }
 0x46c   : > { %v1588_v9 = vpop.f32.mrb[4].mxu0 }
 0x46d   : > { %v1592_v10 = vmul.f32 0.25, %v1588_v9  ;;  %v2563_v11 = vpop.f32.mrb[5].mxu0  ;;  %v1427_v12 = vsel %vm1084_vm4, %v1426_v8, -inf }
 0x46e   : > { %1428 = vmax.xlane.f32.xlu0 %v1427_v12  ;;  %2636 = vmatpush3.bf16.msra.mxu0 %v2633_v59  ;;  %v1942_v59 = vld [vmem:[%s3521_s20 + $0x38] sm:$0xff] }
 0x46f   : > { %v1593_v13 = vadd.f32 %v1592_v10, %v1425_v3 }
 0x471   : > { %v1594_v14 = vsel %vm1084_vm4, %v1593_v13, -inf }
 0x472   : > { %1595 = vmax.xlane.f32.xlu0 %v1594_v14 }
 0x47b   : > { %1096 = vrot.lane.b32.xlu1 %v3564_v42, %s3101_s25 }
 0x4f3   : > { %v1087_v15 = vpop.xlane.xlu0 %1086 }
 0x4f4   : > { %v1088_v16 = vsub.f32 %v1083_v60, %v1087_v15 }
 0x4f6   : > { %v1089_v17 = vmul.f32 1.442695, %v1088_v16 }
 0x4f7   : > { %v1254_v18 = vpop.xlane.xlu1 %1253 }
 0x4f8   : > { %2777 = vpow2.f32 %v1089_v17  ;;  %v1255_v19 = vsub.f32 %v1251_v2, %v1254_v18 }
 0x4fa   : > { %v1256_v20 = vmul.f32 1.442695, %v1255_v19 }
 0x4fb   : > { %v1097_v21 = vpop.permute.xlu1 %1096  ;;  %v1429_v22 = vpop.xlane.xlu0 %1428 }
 0x4fc   : > { %2779 = vpow2.f32 %v1256_v20  ;;  %v1430_v23 = vsub.f32 %v1426_v8, %v1429_v22  ;;  %2535 = vmatpush3.msra.mxu1 %v1097_v21 }
 0x4fd   : > { %2544 = vmatprep.subr.mxu1 %v3096_v38 }
 0x4fe   : > { %v1431_v24 = vmul.f32 1.442695, %v1430_v23 }
 0x4ff   : > { %v1596_v25 = vpop.xlane.xlu0 %1595 }
 0x500   : > { %2781 = vpow2.f32 %v1431_v24  ;;  %v1597_v26 = vsub.f32 %v1593_v13, %v1596_v25  ;;  %v1825_v24 = vld [vmem:[%s3515_s15] sm:$0xff]  ;;  %v1826_v25 = vld [vmem:[%s3515_s15 + $0x8] sm:$0xff] }
 0x502   : > { %v2778_v27 = vpop.eup %2777  ;;  %v1598_v28 = vmul.f32 1.442695, %v1597_v26  ;;  %v2637_v26 = vpack.c.bf16 %v1826_v25, %v1825_v24 }
 0x503   : > { %v1091_v29 = vsel %vm1084_vm4, %v2778_v27, 0.0 }
 0x504   : > { %2783 = vpow2.f32 %v1598_v28  ;;  %1092 = vadd.xlane.f32.xlu1 %v1091_v29  ;;  %v1828_v28 = vld [vmem:[%s3515_s15 + $0x18] sm:$0xff] }
 0x506   : > { %v2780_v30 = vpop.eup %2779 }
 0x507   : > { %v1258_v31 = vsel %vm1084_vm4, %v2780_v30, 0.0 }
 0x508   : > { %1259 = vadd.xlane.f32.xlu0 %v1258_v31 }
 0x50a   : > { %v2782_v32 = vpop.eup %2781 }
 0x50b   : > { %v1433_v33 = vsel %vm1084_vm4, %v2782_v32, 0.0 }
 0x50c   : > { %1434 = vadd.xlane.f32.xlu1 %v1433_v33 }
 0x50e   : > { %v2784_v34 = vpop.eup %2783 }
 0x50f   : > { %v1600_v36 = vsel %vm1084_vm4, %v2784_v34, 0.0 }
 0x510   : > { %1601 = vadd.xlane.f32.xlu0 %v1600_v36 }
 0x51d   : > { %1438 = vrot.lane.b32.xlu1 %v3568_v43, %s3101_s25 }
 0x521   : > { %1605 = vrot.lane.b32.xlu1 %v3568_v43, %s3102_s1 }
 0x526   : > { %1263 = vrot.lane.b32.xlu0 %v3564_v42, %s3102_s1 }
 0x591   : > { %v1093_v39 = vpop.xlane.xlu1 %1092 }
 0x592   : > { %2785 = vrcp.f32 %v1093_v39 }
 0x595   : > { %v1260_v40 = vpop.xlane.xlu0 %1259 }
 0x596   : > { %2787 = vrcp.f32 %v1260_v40  ;;  %v2446_v40 = vld [vmem:[%s3832_s12] ss:$0 sm:$0xff]  ;;  %s3839_s12 = sld [smem:[#allocation38_spill]] (!%p2456_p10) }
 0x599   : > { %v1435_v41 = vpop.xlane.xlu1 %1434 }
 0x59a   : > { %2789 = vrcp.f32 %v1435_v41 }
 0x59c   : > { %v2786_v44 = vpop.eup %2785 }
 0x59d   : > { %v1095_v45 = vmul.f32 %v2786_v44, %v2778_v27  ;;  %v1602_v46 = vpop.xlane.xlu0 %1601  ;;  %v1439_v43 = vpop.permute.xlu1 %1438  ;;  %v1827_v27 = vld [vmem:[%s3515_s15 + $0x10] sm:$0xff]  ;;  %v2447_v44 = vld [vmem:[%s725_s26] ss:$0 sm:$0xff] }
 0x59e   : > { %2791 = vrcp.f32 %v1602_v46  ;;  %v2641_v29 = vpack.c.bf16 %v1828_v28, %v1827_v27 }
 0x59f   : > { %2537 = vmatmul.mubr.msk.f32.vlgmr.msra.gmra.mrb[4].mxu1 %vm1084_vm4, %v1095_v45 }
 0x5a0   : > { %v2788_v47 = vpop.eup %2787  ;;  %2546 = vmatprep.mubr.msk.f32.mxu1 %vm3097_vm2, %v3096_v38 }
 0x5a1   : > { %v1262_v48 = vmul.f32 %v2788_v47, %v2780_v30  ;;  %v1264_v49 = vpop.permute.xlu0 %1263  ;;  %v1606_v51 = vpop.permute.xlu1 %1605 }
 0x5a2   : > { %2545 = vmatpush3.msra.mxu1 %v1264_v49 }
 0x5a3   : > { %2547 = vmatmul.mubr.msk.f32.vlgmr.msra.gmra.mrb[6].mxu1 %vm1084_vm4, %v1262_v48  ;;  %2554 = vmatprep.subr.mxu1 %v3096_v38 }
 0x5a4   : > { %v2790_v42 = vpop.eup %2789  ;;  %2555 = vmatpush3.msra.mxu1 %v1439_v43  ;;  %2556 = vmatprep.mubr.msk.f32.mxu1 %vm3097_vm2, %v3096_v38 }
 0x5a5   : > { %v1437_v50 = vmul.f32 %v2790_v42, %v2782_v32  ;;  %2564 = vmatprep.subr.mxu1 %v3096_v38  ;;  %v1935_v42 = vld [vmem:[%s3521_s20] sm:$0xff] }
 0x5a7   : > { %2557 = vmatmul.mubr.msk.f32.vlgmr.msra.gmra.mrb[8].mxu1 %vm1084_vm4, %v1437_v50  ;;  %v1936_v50 = vld [vmem:[%s3521_s20 + $0x8] sm:$0xff] }
 0x5a8   : > { %v2792_v52 = vpop.eup %2791  ;;  %2565 = vmatpush3.msra.mxu1 %v1606_v51  ;;  %2566 = vmatprep.mubr.msk.f32.mxu1 %vm3097_vm2, %v3096_v38  ;;  %v2645_v51 = vpack.c.bf16 %v1936_v50, %v1935_v42  ;;  %v2455_v42 = vld [vmem:[%s847_s18] ss:$0 sm:$0xff] }
 0x5a9   : > { %v1604_v53 = vmul.f32 %v2792_v52, %v2784_v34  ;;  %2638 = vmatprep.subr.bf16.mxu1 %v2637_v26  ;;  %v1937_v52 = vld [vmem:[%s3521_s20 + $0x10] sm:$0xff] }
 0x5aa   : > { %2646 = vmatprep.subr.bf16.mxu0 %v2645_v51 }
 0x5ab   : > { %2567 = vmatmul.mubr.msk.f32.vlgmr.msra.gmra.mrb[10].mxu1 %vm1084_vm4, %v1604_v53  ;;  %v1938_v53 = vld [vmem:[%s3521_s20 + $0x18] sm:$0xff] }
 0x5ac   : > { %2640 = vmatpush3.bf16.msra.mxu1 %v2637_v26  ;;  %v2649_v54 = vpack.c.bf16 %v1938_v53, %v1937_v52 }
 0x5ad   : > { %2642 = vmatprep.subr.bf16.mxu1 %v2641_v29 }
 0x5b0   : > { %2644 = vmatpush3.bf16.msra.mxu1 %v2641_v29 }
 0x672   : > { %v1168_v60 = vpop.f32.mrb[4].mxu1 }
 0x673   : > { %v2538_v61 = vpop.f32.mrb[5].mxu1 }
 0x674   : > { %v2448_v61 = vld [vmem:[%s3834_s11] ss:$0 sm:$0xff] }
 0x676   : > { %v1335_v62 = vpop.f32.mrb[6].mxu1 }
 0x677   : > { %1340 = vrot.lane.b32.xlu0 %v1335_v62, %s3103_s10  ;;  %v2548_v38 = vpop.f32.mrb[7].mxu1 }
 0x67a   : > { %v1510_v63 = vpop.f32.mrb[8].mxu1 }
 0x67b   : > { %v2558_v0 = vpop.f32.mrb[9].mxu1 }
 0x67e   : > { %v1677_v1 = vpop.f32.mrb[10].mxu1 }
 0x67f   : > { %1682 = vrot.lane.b32.xlu1 %v1677_v1, %s3103_s10  ;;  %v2568_v2 = vpop.f32.mrb[11].mxu1 }
 0x6e9   : > { %v1341_v3 = vpop.permute.xlu0 %1340 }
 0x6ea   : > { %v1343_v4 = vsel %vm1003_vm3, %v1168_v60, %v1341_v3  ;;  %v2657_v60 = vpack.c.bf16 %v1942_v59, %v1941_v58  ;;  %v2661_v58 = vpack.c.bf16 (!%p2456_p10), %v2085_v56, %v2084_v55  ;;  %v2087_v59 = vld [vmem:[%s3838_s6 + $0x18] sm:$0xff] (!%p2456_p10) }
 0x6eb   : > { %2577 = vmatprep.mubr.msk.f32.mxu0 %vm915_vm1, %v1343_v4 }
 0x6f1   : > { %v1683_v5 = vpop.permute.xlu1 %1682 }
 0x6f2   : > { %v1685_v6 = vsel %vm1003_vm3, %v1510_v63, %v1683_v5 }
 0x6f3   : > { %2578 = vmatmul.mubr.msk.f32.vlgmr.msra.gmra.mrb[6].mxu0 %vm915_vm1, %v1685_v6 }
 0x6f4   : > { %2648 = vmatpush3.bf16.msra.mxu0 %v2645_v51 }
 0x6f5   : > { %2650 = vmatprep.subr.bf16.mxu0 %v2649_v54 }
 0x6f8   : > { %2652 = vmatpush3.bf16.msra.mxu0 %v2649_v54 }
 0x6f9   : > { %2654 = vmatprep.subr.bf16.mxu0 %v2653_v57 }
 0x6fc   : > { %2656 = vmatpush3.bf16.msra.mxu0 %v2653_v57  ;;  %v2086_v57 = vld [vmem:[%s3838_s6 + $0x10] sm:$0xff] (!%p2456_p10) }
 0x6fd   : > { %2658 = vmatprep.subr.bf16.mxu0 %v2657_v60 }
 0x700   : > { %2660 = vmatpush3.bf16.msra.mxu0 %v2657_v60  ;;  %v2665_v60 = vpack.c.bf16 (!%p2456_p10), %v2087_v59, %v2086_v57 }
 0x701   : > { %2662 = vmatprep.subr.bf16.mxu0 (!%p2456_p10), %v2661_v58 }
 0x7c6   : > { %v2579_v8 = vpop.f32.mrb[6].mxu0 }
 0x7c7   : > { %v1775_v9 = vadd.f32 %v2579_v8, %v2443_v7  ;;  %v1769_v10 = vpop.f32.mrb[7].mxu0 }
 0x7c8   : > { %v1770_v11 = vadd.f32 %v2443_v7, %v1769_v10 }
 0x7c9   : > { %v1779_v12 = vadd.f32 %v1775_v9, %v3552_v37 }
 0x7ca   : > { %v1778_v13 = vadd.f32 %v1770_v11, %v3548_v35 }
 0x7cb   : > { %v1785_v14 = vsel %vm915_vm1, %v1779_v12, 0.0 }
 0x7cc   : > { %1786 = vadd.xlane.f32.xlu1 %v1785_v14  ;;  %v1782_v15 = vsel %vm915_vm1, %v1778_v13, 0.0 }
 0x7cd   : > { %1783 = vadd.xlane.f32.xlu0 %v1782_v15 }
 0x859   : > { %v1787_v16 = vpop.xlane.xlu1 %1786 }
 0x85a   : > { %v1790_v17 = vmul.f32 0.03125, %v1787_v16  ;;  %v1784_v18 = vpop.xlane.xlu0 %1783 }
 0x85b   : > { %v1789_v19 = vmul.f32 0.03125, %v1784_v18 }
 0x85c   : > { %v1792_v20 = vsub.f32 %v1779_v12, %v1790_v17 }
 0x85d   : > { %v1791_v21 = vsub.f32 %v1778_v13, %v1789_v19  ;;  %v2451_v19 = vld [vmem:[%s841_s8] ss:$0 sm:$0xff] }
 0x85e   : > { %v1794_v35 = vmul.f32 %v1792_v20, %v1792_v20 }
 0x85f   : > { %v1793_v22 = vmul.f32 %v1791_v21, %v1791_v21 }
 0x860   : > { %v1798_v23 = vsel %vm915_vm1, %v1794_v35, 0.0 }
 0x861   : > { %v1795_v37 = vsel %vm915_vm1, %v1793_v22, 0.0 }
 0x862   : > { %1796 = vadd.xlane.f32.xlu0 %v1795_v37 }
 0x866   : > { %1799 = vadd.xlane.f32.xlu0 %v1798_v23 }
 0x8ef   : > { %v1797_v30 = vpop.xlane.xlu0 %1796 }
 0x8f0   : > { %v1801_v31 = vmul.f32 0.03125, %v1797_v30 }
 0x8f2   : > { %v1803_v32 = vadd.f32 1e-12, %v1801_v31 }
 0x8f3   : > { %v1800_v33 = vpop.xlane.xlu0 %1799 }
 0x8f4   : > { %2793 = vrsqrt.f32 %v1803_v32  ;;  %v1802_v34 = vmul.f32 0.03125, %v1800_v33 }
 0x8f6   : > { %v1804_v36 = vadd.f32 1e-12, %v1802_v34 }
 0x8f8   : > { %2795 = vrsqrt.f32 %v1804_v36 }
 0x8fe   : > { %v2794_v39 = vpop.eup %2793 }
 0x8ff   : > { %v1807_v41 = vmul.f32 %v2794_v39, %v1791_v21 }
 0x901   : > { %v1815_v45 = vmul.f32 %v2446_v40, %v1807_v41 }
 0x902   : > { %v2796_v46 = vpop.eup %2795 }
 0x903   : > { %v1808_v47 = vmul.f32 %v2796_v46, %v1792_v20  ;;  %v1823_v48 = vadd.f32 %v2447_v44, %v1815_v45 }
 0x905   : > { %v1816_v43 = vmul.f32 %v2446_v40, %v1808_v47  ;;  %2588 = vmatprep.mubr.msk.f32.mxu1 %vm915_vm1, %v1823_v48 }
 0x907   : > { %v1824_v49 = vadd.f32 %v2447_v44, %v1816_v43 }
 0x909   : > { %2589 = vmatmul.mubr.msk.f32.vlgmr.msra.gmra.mrb[12].mxu1 %vm915_vm1, %v1824_v49 }
 0x9dc   : > { %v2590_v62 = vpop.f32.mrb[12].mxu1 }
 0x9dd   : > { %v1914_v38 = vadd.f32 %v2590_v62, %v2448_v61  ;;  %v1908_v63 = vpop.f32.mrb[13].mxu1 }
 0x9de   : > { %v1909_v0 = vadd.f32 %v2448_v61, %v1908_v63  ;;  %v2457_v61 = vld [vmem:[%s3839_s12] ss:$0 sm:$0xff] (!%p2456_p10) }
 0x9df   : > { %v1918_v1 = vmul.f32 %v1914_v38, %v1914_v38 }
 0x9e0   : > { %v1917_v2 = vmul.f32 %v1909_v0, %v1909_v0 }
 0x9e1   : > { %v1920_v3 = vmul.f32 %v1918_v1, %v1914_v38 }
 0x9e2   : > { %v1919_v4 = vmul.f32 %v1917_v2, %v1909_v0 }
 0x9e3   : > { %v1922_v5 = vmul.f32 0.044715, %v1920_v3 }
 0x9e4   : > { %v1921_v6 = vmul.f32 0.044715, %v1919_v4 }
 0x9e5   : > { %v1924_v7 = vadd.f32 %v1922_v5, %v1914_v38 }
 0x9e6   : > { %v1923_v8 = vadd.f32 %v1921_v6, %v1909_v0 }
 0x9e7   : > { %v1926_v9 = vmul.f32 0.7978846, %v1924_v7 }
 0x9e8   : > { %v1925_v10 = vmul.f32 0.7978846, %v1923_v8 }
 0x9e9   : > { %2797 = vtanh.f32 %v1926_v9 }
 0x9ea   : > { %2799 = vtanh.f32 %v1925_v10 }
 0x9f3   : > { %v2798_v11 = vpop.eup %2797 }
 0x9f4   : > { %v2800_v12 = vpop.eup %2799  ;;  %v1930_v13 = vadd.f32 1.0, %v2798_v11 }
 0x9f5   : > { %v1929_v14 = vadd.f32 1.0, %v2800_v12 }
 0x9f6   : > { %v1932_v15 = vmul.f32 0.5, %v1930_v13 }
 0x9f7   : > { %v1931_v16 = vmul.f32 0.5, %v1929_v14 }
 0x9f8   : > { %v1934_v18 = vmul.f32 %v1932_v15, %v1914_v38 }
 0x9f9   : > { %v1933_v17 = vmul.f32 %v1931_v16, %v1909_v0 }
 0x9fb   : > { %2607 = vmatprep.mubr.msk.f32.mxu0 %vm1950_vm5, %v1933_v17 }
 0x9fc   : > { %2608 = vmatmul.mubr.msk.f32.vlgmr.msra.gmra.mrb[8].mxu0 %vm1950_vm5, %v1934_v18 }
 0x9fd   : > { %2664 = vmatpush3.bf16.msra.mxu0 (!%p2456_p10), %v2661_v58 }
 0x9fe   : > { %2666 = vmatprep.subr.bf16.mxu0 (!%p2456_p10), %v2665_v60 }
 0xa01   : > { %2668 = vmatpush3.bf16.msra.mxu0 (!%p2456_p10), %v2665_v60 }
 0xacf   : > { %v2609_v20 = vpop.f32.mrb[8].mxu0 }
 0xad0   : > { %v2029_v21 = vadd.f32 %v2609_v20, %v2451_v19  ;;  %v2023_v22 = vpop.f32.mrb[9].mxu0 }
 0xad1   : > { %v2024_v37 = vadd.f32 %v2451_v19, %v2023_v22 }
 0xad2   : > { %v2033_v35 = vadd.f32 %v2029_v21, %v1824_v49 }
 0xad3   : > { %v2032_v23 = vadd.f32 %v2024_v37, %v1823_v48  ;;  %v2454_v48 = vld [vmem:[%s844_s2] ss:$0 sm:$0xff] }
 0xad4   : > { %v2039_v24 = vsel %vm915_vm1, %v2033_v35, 0.0 }
 0xad5   : > { %2040 = vadd.xlane.f32.xlu0 %v2039_v24  ;;  %v2036_v25 = vsel %vm915_vm1, %v2032_v23, 0.0 }
 0xad6   : > { %2037 = vadd.xlane.f32.xlu1 %v2036_v25 }
 0xb62   : > { %v2041_v26 = vpop.xlane.xlu0 %2040 }
 0xb63   : > { %v2043_v27 = vmul.f32 0.03125, %v2041_v26  ;;  %v2038_v28 = vpop.xlane.xlu1 %2037 }
 0xb64   : > { %v2042_v29 = vmul.f32 0.03125, %v2038_v28 }
 0xb65   : > { %v2045_v30 = vsub.f32 %v2033_v35, %v2043_v27 }
 0xb66   : > { %v2044_v31 = vsub.f32 %v2032_v23, %v2042_v29 }
 0xb67   : > { %v2047_v32 = vmul.f32 %v2045_v30, %v2045_v30 }
 0xb68   : > { %v2046_v33 = vmul.f32 %v2044_v31, %v2044_v31 }
 0xb69   : > { %v2051_v34 = vsel %vm915_vm1, %v2047_v32, 0.0 }
 0xb6a   : > { %2052 = vadd.xlane.f32.xlu0 %v2051_v34  ;;  %v2048_v36 = vsel %vm915_vm1, %v2046_v33, 0.0 }
 0xb6b   : > { %2049 = vadd.xlane.f32.xlu1 %v2048_v36 }
 0xbf7   : > { %v2053_v39 = vpop.xlane.xlu0 %2052 }
 0xbf8   : > { %v2055_v40 = vmul.f32 0.03125, %v2053_v39  ;;  %v2050_v41 = vpop.xlane.xlu1 %2049 }
 0xbf9   : > { %v2054_v44 = vmul.f32 0.03125, %v2050_v41 }
 0xbfa   : > { %v2057_v45 = vadd.f32 1e-12, %v2055_v40 }
 0xbfb   : > { %v2056_v46 = vadd.f32 1e-12, %v2054_v44 }
 0xbfc   : > { %2801 = vrsqrt.f32 %v2057_v45 }
 0xbfd   : > { %2803 = vrsqrt.f32 %v2056_v46 }
 0xc06   : > { %v2802_v47 = vpop.eup %2801 }
 0xc07   : > { %v2804_v43 = vpop.eup %2803  ;;  %v2061_v49 = vmul.f32 %v2802_v47, %v2045_v30 }
 0xc08   : > { %v2060_v50 = vmul.f32 %v2804_v43, %v2044_v31  ;;  %2083 = sbr.rel (%p2456_p10) target bundleno = 3303 (0xce7), region = 128 }
 0xc09   : > { %v2069_v51 = vmul.f32 %v2454_v48, %v2061_v49 }
 0xc0a   : > { %v2068_v52 = vmul.f32 %v2454_v48, %v2060_v50 }
 0xc0b   : > { %v2077_v53 = vadd.f32 %v2455_v42, %v2069_v51 }
 0xc0c   : > { %v2076_v54 = vadd.f32 %v2455_v42, %v2068_v52 }
 0xc0d   : > { %2079 = vst.msk [vmem:[#allocation2 + $0x8] sm:$0xff] %vm915_vm1, %v2077_v53 }
 0xc0e   : > { %2078 = vst.msk [vmem:[#allocation2] sm:$0xff] %vm915_vm1, %v2076_v54  ;;  %2618 = vmatprep.mubr.msk.f32.mxu0 (!%p2456_p10), %vm915_vm1, %v2076_v54 }
 0xc0f   : > { %2619 = vmatmul.mubr.msk.f32.vlgmr.msra.gmra.mrb[0].mxu0 %vm915_vm1, %v2077_v53 }
 0xce2   : > { %v2620_v62 = vpop.f32.mrb[0].mxu0 }
 0xce3   : > { %v2173_v38 = vadd.f32 %v2620_v62, %v2457_v61  ;;  %v2167_v63 = vpop.f32.mrb[1].mxu0 }
 0xce4   : > { %v2168_v0 = vadd.f32 %v2457_v61, %v2167_v63 }
 0xce5   : > { %2177 = vst [vmem:[#allocation15 + $0x8] sm:$0xff] %v2173_v38 }
 0xce6   : > { %2176 = vst [vmem:[#allocation15] sm:$0xff] %v2168_v0 }
 0xce7 PF: > { %p2723_p2 = scmp.eq.s32.totalorder %s3221_s0, 1  ;;  %s3104_s21 = smov [#allocation15]  }
 0xce8   : > { %s2184_s15 = sshll.u32 %s3104_s21, 4  ;;  %s2185_s15 = int_to_ptr.vmem [resolvable:$true] %s2184_s15 }
 0xce9   : > { %s3009_s29 = scalar_lea.vmem %s2185_s15, 256  ;;  %p3016_p7 = scmp.lt.s32.totalorder %s2185_s15, %s2185_s15 }
 0xcea   : > { %p3010_p6 = scmp.ne.s32.totalorder %s2185_s15, %s3009_s29  ;;  %p3017_p0 = scmp.lt.s32.totalorder %s3009_s29, %s3009_s29 }
 0xcec   : > { %p3011_p11 = pnand %p3010_p6, %p2723_p2  ;;  %p3018_p5 = por %p3017_p0, %p3016_p7 }
 0xcee   : > { %p3012_p3 = pneg %p3011_p11 }
 0xcf0   : > { %p3019_p8 = pnand %p3018_p5, %p3012_p3 }
 0xcf2   : > { %3022 = shalt.err (!%p3019_p8)
}
 0xcf3   : > { %s3840_s19 = sld [smem:[#allocation39_spill]] }
 0xcf9   : > { %s3023_s22 = scalar_lea.hbm %s3840_s19, 256 }
 0xcfa   : > { %p3024_p12 = scmp.ne.s32.totalorder %s3840_s19, %s3023_s22  ;;  %p3029_p1 = scmp.lt.u32.totalorder %s3023_s22, %s3840_s19 }
 0xcfc   : > { %p3025_p9 = pnand %p3024_p12, %p2723_p2 }
 0xcfe   : > { %p3026_p4 = pneg %p3025_p9 }
 0xd00   : > { %p3031_p13 = pnand %p3029_p1, %p3026_p4 }
 0xd02   : > { %3034 = shalt.err (!%p3031_p13)
}
 0xd03   : > { %s3105_s27 = smov 128   ;;  %s3106_s17 = smov 8  }
 0xd04   : > { %2690 = dma.vmem_to_hbm [thread:$0]  (%p2723_p2), %s2185_s15, 256, %s3840_s19, [#allocation5], %s3105_s27, %s3105_s27, %s3106_s17  }
 0xd05   : > { %3068 = dma.done.wait (%p2723_p2), [#allocation5], 256  }
 0xd06   : > { %3070 = vsyncadd (%p2723_p2), [#allocation5], 4294967040 }
 0xd07 PF: > { %s3841_s30 = sld [smem:[#allocation22_spill]]  ;;  %s3842_s23 = sld [smem:[#allocation21_spill]] }
 0xd08   : > { %s3843_s29 = sld [smem:[#allocation23_spill]]  ;;  %s3844_s27 = smov %s3077_s28 }
 0xd0d   : > { %p34_p10 = scmp.ge.s32.totalorder %s3841_s30, 4   ;;  %s3845_s28 = smov %s3842_s23 }
 0xd0f   :  { %36 = sbr.rel (!%p34_p10) target bundleno = 25 (0x19), region = 209 }
 0xd16   :  { %2200 = vsyncpa [#allocation4], 1 }
 0xd17   :  { %2202 = vsyncpa [#allocation4 + $0x1], 1 }
 0xd18   :  { %2203 = vsyncpa [#allocation7], 1 }
 0xd19   :  { %2204 = vsyncpa [#allocation10], 1 }
 0xd1a   :  { %2206 = vsyncpa [#allocation10 + $0x1], 1 }
 0xd1b   :  { %2207 = vsyncpa [#allocation13], 1 }
 0xd1c   :  { %2209 = vsyncpa [#allocation13 + $0x1], 1 }
 0xd1d   :  { %2210 = vsyncpa [#allocation5], 1 }
 0xd1e   :  { %2212 = vsyncpa [#allocation5 + $0x1], 1 }

</bundles_post_ra>
